<compile_context>
chip_gen: v6e
topology: v6e:2x2x1
jax: 0.10.0
libtpu: 0.0.40
codegen_flags: <defaults>
</compile_context>

<pallas_src>
import numpy as np
import jax
import jax.numpy as jnp
from jax import lax
from jax.experimental import pallas as pl
from jax.experimental.pallas import tpu as pltpu


_GATHER_UNROLL = 8  # rows per descriptor-issue chunk (T is always a multiple of 8)


def _make_embed_ln_kernel(T, S_pad, n_s, D, eps=1e-12):
    """T = tokens per tile, S_pad = padded seq length, n_s = seq tiles per sequence."""
    inv_d = 1.0 / float(D)

    def kernel(ids_ref, wemb_hbm, pos_ref, gamma_ref, beta_ref, out_ref,
               wbuf, sems):
        b = pl.program_id(0)          # batch row
        s = pl.program_id(1)          # sequence tile within the row
        slot = s & 1                  # double-buffer slot for the current tile

        def issue_gather(seq_tile, dst_slot):
            base = pl.multiple_of(b * S_pad + seq_tile * T, 8)

            @pl.loop(0, T // _GATHER_UNROLL)
            def _(c):
                t0 = pl.multiple_of(c * _GATHER_UNROLL, _GATHER_UNROLL)
                for u in range(_GATHER_UNROLL):        # static partial unroll
                    t = t0 + u
                    row = ids_ref[base + t]            # token id from SMEM
                    pltpu.make_async_copy(
                        wemb_hbm.at[row],              # (D,) row in HBM (native dtype)
                        wbuf.at[dst_slot, t],          # (D,) row in VMEM scratch
                        sems.at[dst_slot],
                    ).start()

        # First tile of this sequence: fetch into slot 0 (no predecessor prefetched it).
        @pl.when(s == 0)
        def _():
            issue_gather(0, 0)

        # Prefetch the next tile of the same sequence into the other slot so its HBM
        # gather overlaps the current tile's wait + compute.
        @pl.when(s + 1 < n_s)
        def _():
            issue_gather(s + 1, 1 - slot)

        # Single wait sized for the whole (T, D) slab (sum of the T row-copy signals).
        pltpu.make_async_copy(
            wemb_hbm.at[pl.ds(0, T)], wbuf.at[slot], sems.at[slot]).wait()

        # word + position embeddings (upcast to f32 in-kernel), then LayerNorm.
        pos_t = pos_ref[pl.ds(pl.multiple_of(s * T, 8), T), :]
        x = wbuf[slot].astype(jnp.float32) + pos_t.astype(jnp.float32)   # (T, D)

        # Fused one-pass statistics: E[x] and E[x^2]  (biased variance, torch LN).
        s1 = jnp.sum(x, axis=-1, keepdims=True)
        s2 = jnp.sum(x * x, axis=-1, keepdims=True)
        mean = s1 * inv_d
        var = jnp.maximum(s2 * inv_d - mean * mean, 0.0)
        inv = lax.rsqrt(var + eps)
        g = gamma_ref[...].astype(jnp.float32)
        bt = beta_ref[...].astype(jnp.float32)
        out_ref[0, :, :] = ((x - mean) * inv * g + bt).astype(out_ref.dtype)

    return kernel


def _pick_seq_tile(S_pad, cap=512):
    for cand in (512, 256, 128, 64, 32, 16, 8):
        if cand <= cap and S_pad % cand == 0:
            return cand
    return 8  # unreachable: S_pad is always a multiple of 8


def embeddings_forward(input_ids, word_emb, pos_emb, gamma, beta,
                       out_dtype=jnp.float32):
    """Forward pass of Embeddings. For best store performance D should be a multiple
    of 128 (real models: 768/1024/...); smaller D is still correct (masked stores)."""
    B, S = input_ids.shape
    V, D = word_emb.shape

    S_pad = ((S + 7) // 8) * 8
    T = _pick_seq_tile(S_pad)
    n_s = S_pad // T                 # == cdiv(S, T): last tile may be ragged

    # Clamp ids (guards the data-dependent HBM gather) and pad the sequence.
    ids = jnp.clip(input_ids.astype(jnp.int32), 0, V - 1)
    if S_pad != S:
        ids = jnp.pad(ids, ((0, 0), (0, S_pad - S)))
    ids_flat = ids.reshape(-1)                       # (B * S_pad,) int32 -> SMEM

    # Positional rows the kernel needs (resident block); keep native dtype.
    if pos_emb.shape[0] >= S_pad:
        pos = pos_emb[:S_pad]
    else:
        pos = jnp.pad(pos_emb, ((0, S_pad - pos_emb.shape[0]), (0, 0)))

    gamma2 = gamma.reshape(1, D)
    beta2 = beta.reshape(1, D)

    kernel = _make_embed_ln_kernel(T, S_pad, n_s, D)

    grid_spec = pltpu.PrefetchScalarGridSpec(
        num_scalar_prefetch=1,                       # flat token ids -> SMEM
        grid=(B, n_s),
        in_specs=[
            pl.BlockSpec(memory_space=pl.ANY),                     # word-emb table (HBM)
            pl.BlockSpec((S_pad, D), lambda b, s, ids: (0, 0)),    # resident pos table
            pl.BlockSpec((1, D), lambda b, s, ids: (0, 0)),        # gamma (resident)
            pl.BlockSpec((1, D), lambda b, s, ids: (0, 0)),        # beta  (resident)
        ],
        out_specs=pl.BlockSpec((1, T, D), lambda b, s, ids: (b, s, 0)),
        scratch_shapes=[
            pltpu.VMEM((2, T, D), word_emb.dtype),   # double-buffered gathered rows
            pltpu.SemaphoreType.DMA((2,)),           # one DMA sem per slot
        ],
    )

    return pl.pallas_call(
        kernel,
        out_shape=jax.ShapeDtypeStruct((B, S, D), out_dtype),
        grid_spec=grid_spec,
        compiler_params=pltpu.CompilerParams(
            dimension_semantics=("parallel", "arbitrary"),
            vmem_limit_bytes=48 * 1024 * 1024,
        ),
    )(ids_flat, word_emb, pos, gamma2, beta2)


def create_sinusoidal_embeddings(nb_p, dim):
    theta = np.array(
        [[p / np.power(10000, 2 * (j // 2) / dim) for j in range(dim)]
         for p in range(nb_p)], dtype=np.float64)
    E = np.zeros((nb_p, dim), dtype=np.float32)
    E[:, 0::2] = np.sin(theta[:, 0::2])
    E[:, 1::2] = np.cos(theta[:, 1::2])
    return jnp.asarray(E)


def _reference(input_ids, word_emb, pos_emb, gamma, beta):
    B, S = input_ids.shape
    we = word_emb[input_ids]                                  # (B, S, D)
    pe = pos_emb[jnp.arange(S)][None, :, :]                   # (1, S, D)
    x = we + pe
    mean = jnp.mean(x, axis=-1, keepdims=True)
    var = jnp.mean((x - mean) ** 2, axis=-1, keepdims=True)
    return (x - mean) / jnp.sqrt(var + 1e-12) * gamma + beta


if __name__ == "__main__":
    d_model = 128                 # multiple of 128 -> lane-dense (unmasked) stores
    vocab_size = 64
    max_position_embeddings = 64
    batch, seq = 2, 20            # seq=20 -> 3 tiles of 8; last tile is ragged, which
                                  # exercises the masked edge-block writeback and the
                                  # double-buffered gather path.

    key = jax.random.PRNGKey(0)
    k_ids, k_emb, k_g, k_b = jax.random.split(key, 4)

    # deterministic parameter init (nn.Embedding ~ N(0,1), padding_idx=1 zeroed;
    # LayerNorm gamma/beta perturbed from 1/0 so affine handling is actually verified;
    # position table = fixed sinusoids)
    word_emb = jax.random.normal(k_emb, (vocab_size, d_model), dtype=jnp.float32)
    word_emb = word_emb.at[1].set(0.0)                        # padding_idx = 1
    pos_emb = create_sinusoidal_embeddings(max_position_embeddings, d_model)
    gamma = 1.0 + 0.1 * jax.random.normal(k_g, (d_model,), dtype=jnp.float32)
    beta = 0.1 * jax.random.normal(k_b, (d_model,), dtype=jnp.float32)

    input_ids = jax.random.randint(k_ids, (batch, seq), 0, vocab_size, dtype=jnp.int32)

    out = embeddings_forward(input_ids, word_emb, pos_emb, gamma, beta)
    out = jax.block_until_ready(out)

    ref = _reference(input_ids, word_emb, pos_emb, gamma, beta)
    np.testing.assert_allclose(np.asarray(out), np.asarray(ref), rtol=1e-5, atol=1e-5)

    print("KERNEL_OK")
</pallas_src>

<mosaic_0001>
module attributes {stable_mosaic.version = 11 : i64} {
  func.func @kernel(%arg0: i32, %arg1: i32, %arg2: memref<48xi32, #tpu.memory_space<smem>>, %arg3: memref<64x128xf32, #tpu.memory_space<any>>, %arg4: memref<24x128xf32, #tpu.memory_space<vmem>>, %arg5: memref<1x128xf32, #tpu.memory_space<vmem>>, %arg6: memref<1x128xf32, #tpu.memory_space<vmem>>, %arg7: memref<1x8x128xf32, #tpu.memory_space<vmem>>, %arg8: memref<2x8x128xf32, #tpu.memory_space<vmem>>, %arg9: memref<2x!tpu.dma_semaphore, #tpu.memory_space<semaphore_mem>>) attributes {dimension_semantics = [#tpu.dimension_semantics<parallel>, #tpu.dimension_semantics<arbitrary>], iteration_bounds = array<i64: 2, 3>, scalar_prefetch = 1 : i64, scratch_operands = 2 : i64, tpu.core_type = #tpu.core_type<tc>, window_params = [{}, {pipeline_mode = #tpu.pipeline_mode<synchronous>, transform_indices = @transform_1, window_bounds = array<i64: 24, 128>}, {pipeline_mode = #tpu.pipeline_mode<synchronous>, transform_indices = @transform_2, window_bounds = array<i64: 1, 128>}, {pipeline_mode = #tpu.pipeline_mode<synchronous>, transform_indices = @transform_3, window_bounds = array<i64: 1, 128>}, {transform_indices = @transform_4, window_bounds = array<i64: 1, 8, 128>}]} {
    %c1_i32 = arith.constant 1 : i32
    %0 = arith.andi %arg1, %c1_i32 : i32
    %c0_i32 = arith.constant 0 : i32
    %1 = arith.cmpi eq, %arg1, %c0_i32 : i32
    %2 = arith.extui %1 : i1 to i32
    %c0_i32_0 = arith.constant 0 : i32
    %3 = arith.cmpi ne, %2, %c0_i32_0 : i32
    scf.if %3 {
      %c24_i32 = arith.constant 24 : i32
      %50 = arith.muli %arg0, %c24_i32 : i32
      %c0_i32_21 = arith.constant 0 : i32
      %51 = arith.addi %50, %c0_i32_21 : i32
      %52 = tpu.assume_multiple %51, 8 : i32
      %c0_i32_22 = arith.constant 0 : i32
      %c1_i32_23 = arith.constant 1 : i32
      %53 = arith.muli %c0_i32_22, %c1_i32_23 : i32
      %c0_i32_24 = arith.constant 0 : i32
      %54 = arith.addi %c0_i32_24, %53 : i32
      %c8_i32_25 = arith.constant 8 : i32
      %55 = arith.muli %54, %c8_i32_25 : i32
      %56 = tpu.assume_multiple %55, 8 : i32
      %c0_i32_26 = arith.constant 0 : i32
      %57 = arith.addi %56, %c0_i32_26 : i32
      %58 = arith.addi %52, %57 : i32
      %59 = arith.index_cast %58 : i32 to index
      %60 = memref.load %arg2[%59] : memref<48xi32, #tpu.memory_space<smem>>
      %c0_i32_27 = arith.constant 0 : i32
      %c0_i32_28 = arith.constant 0 : i32
      %c0_i32_29 = arith.constant 0 : i32
      %61 = tpu.memref_slice %arg3[%60, %c0_i32_29] : memref<64x128xf32, #tpu.memory_space<any>> -> memref<1x128xf32, #tpu.memory_space<any>>
      %62 = tpu.memref_squeeze %61 : memref<1x128xf32, #tpu.memory_space<any>> -> memref<128xf32, #tpu.memory_space<any>>
      %c0_i32_30 = arith.constant 0 : i32
      %63 = tpu.memref_slice %arg8[%c0_i32_27, %57, %c0_i32_30] : memref<2x8x128xf32, #tpu.memory_space<vmem>> -> memref<1x1x128xf32, #tpu.memory_space<vmem>>
      %64 = tpu.memref_squeeze %63 : memref<1x1x128xf32, #tpu.memory_space<vmem>> -> memref<128xf32, #tpu.memory_space<vmem>>
      %65 = tpu.memref_slice %arg9[%c0_i32_28] : memref<2x!tpu.dma_semaphore, #tpu.memory_space<semaphore_mem>> -> memref<1x!tpu.dma_semaphore, #tpu.memory_space<semaphore_mem>>
      %66 = tpu.memref_squeeze %65 : memref<1x!tpu.dma_semaphore, #tpu.memory_space<semaphore_mem>> -> memref<!tpu.dma_semaphore, #tpu.memory_space<semaphore_mem>>
      tpu.enqueue_dma source(%62 : memref<128xf32, #tpu.memory_space<any>>) target(%64 : memref<128xf32, #tpu.memory_space<vmem>>) target_semaphore(%66 : memref<!tpu.dma_semaphore, #tpu.memory_space<semaphore_mem>>)
      %c1_i32_31 = arith.constant 1 : i32
      %67 = arith.addi %56, %c1_i32_31 : i32
      %68 = arith.addi %52, %67 : i32
      %69 = arith.index_cast %68 : i32 to index
      %70 = memref.load %arg2[%69] : memref<48xi32, #tpu.memory_space<smem>>
      %c0_i32_32 = arith.constant 0 : i32
      %c0_i32_33 = arith.constant 0 : i32
      %c0_i32_34 = arith.constant 0 : i32
      %71 = tpu.memref_slice %arg3[%70, %c0_i32_34] : memref<64x128xf32, #tpu.memory_space<any>> -> memref<1x128xf32, #tpu.memory_space<any>>
      %72 = tpu.memref_squeeze %71 : memref<1x128xf32, #tpu.memory_space<any>> -> memref<128xf32, #tpu.memory_space<any>>
      %c0_i32_35 = arith.constant 0 : i32
      %73 = tpu.memref_slice %arg8[%c0_i32_32, %67, %c0_i32_35] : memref<2x8x128xf32, #tpu.memory_space<vmem>> -> memref<1x1x128xf32, #tpu.memory_space<vmem>>
      %74 = tpu.memref_squeeze %73 : memref<1x1x128xf32, #tpu.memory_space<vmem>> -> memref<128xf32, #tpu.memory_space<vmem>>
      %75 = tpu.memref_slice %arg9[%c0_i32_33] : memref<2x!tpu.dma_semaphore, #tpu.memory_space<semaphore_mem>> -> memref<1x!tpu.dma_semaphore, #tpu.memory_space<semaphore_mem>>
      %76 = tpu.memref_squeeze %75 : memref<1x!tpu.dma_semaphore, #tpu.memory_space<semaphore_mem>> -> memref<!tpu.dma_semaphore, #tpu.memory_space<semaphore_mem>>
      tpu.enqueue_dma source(%72 : memref<128xf32, #tpu.memory_space<any>>) target(%74 : memref<128xf32, #tpu.memory_space<vmem>>) target_semaphore(%76 : memref<!tpu.dma_semaphore, #tpu.memory_space<semaphore_mem>>)
      %c2_i32 = arith.constant 2 : i32
      %77 = arith.addi %56, %c2_i32 : i32
      %78 = arith.addi %52, %77 : i32
      %79 = arith.index_cast %78 : i32 to index
      %80 = memref.load %arg2[%79] : memref<48xi32, #tpu.memory_space<smem>>
      %c0_i32_36 = arith.constant 0 : i32
      %c0_i32_37 = arith.constant 0 : i32
      %c0_i32_38 = arith.constant 0 : i32
      %81 = tpu.memref_slice %arg3[%80, %c0_i32_38] : memref<64x128xf32, #tpu.memory_space<any>> -> memref<1x128xf32, #tpu.memory_space<any>>
      %82 = tpu.memref_squeeze %81 : memref<1x128xf32, #tpu.memory_space<any>> -> memref<128xf32, #tpu.memory_space<any>>
      %c0_i32_39 = arith.constant 0 : i32
      %83 = tpu.memref_slice %arg8[%c0_i32_36, %77, %c0_i32_39] : memref<2x8x128xf32, #tpu.memory_space<vmem>> -> memref<1x1x128xf32, #tpu.memory_space<vmem>>
      %84 = tpu.memref_squeeze %83 : memref<1x1x128xf32, #tpu.memory_space<vmem>> -> memref<128xf32, #tpu.memory_space<vmem>>
      %85 = tpu.memref_slice %arg9[%c0_i32_37] : memref<2x!tpu.dma_semaphore, #tpu.memory_space<semaphore_mem>> -> memref<1x!tpu.dma_semaphore, #tpu.memory_space<semaphore_mem>>
      %86 = tpu.memref_squeeze %85 : memref<1x!tpu.dma_semaphore, #tpu.memory_space<semaphore_mem>> -> memref<!tpu.dma_semaphore, #tpu.memory_space<semaphore_mem>>
      tpu.enqueue_dma source(%82 : memref<128xf32, #tpu.memory_space<any>>) target(%84 : memref<128xf32, #tpu.memory_space<vmem>>) target_semaphore(%86 : memref<!tpu.dma_semaphore, #tpu.memory_space<semaphore_mem>>)
      %c3_i32_40 = arith.constant 3 : i32
      %87 = arith.addi %56, %c3_i32_40 : i32
      %88 = arith.addi %52, %87 : i32
      %89 = arith.index_cast %88 : i32 to index
      %90 = memref.load %arg2[%89] : memref<48xi32, #tpu.memory_space<smem>>
      %c0_i32_41 = arith.constant 0 : i32
      %c0_i32_42 = arith.constant 0 : i32
      %c0_i32_43 = arith.constant 0 : i32
      %91 = tpu.memref_slice %arg3[%90, %c0_i32_43] : memref<64x128xf32, #tpu.memory_space<any>> -> memref<1x128xf32, #tpu.memory_space<any>>
      %92 = tpu.memref_squeeze %91 : memref<1x128xf32, #tpu.memory_space<any>> -> memref<128xf32, #tpu.memory_space<any>>
      %c0_i32_44 = arith.constant 0 : i32
      %93 = tpu.memref_slice %arg8[%c0_i32_41, %87, %c0_i32_44] : memref<2x8x128xf32, #tpu.memory_space<vmem>> -> memref<1x1x128xf32, #tpu.memory_space<vmem>>
      %94 = tpu.memref_squeeze %93 : memref<1x1x128xf32, #tpu.memory_space<vmem>> -> memref<128xf32, #tpu.memory_space<vmem>>
      %95 = tpu.memref_slice %arg9[%c0_i32_42] : memref<2x!tpu.dma_semaphore, #tpu.memory_space<semaphore_mem>> -> memref<1x!tpu.dma_semaphore, #tpu.memory_space<semaphore_mem>>
      %96 = tpu.memref_squeeze %95 : memref<1x!tpu.dma_semaphore, #tpu.memory_space<semaphore_mem>> -> memref<!tpu.dma_semaphore, #tpu.memory_space<semaphore_mem>>
      tpu.enqueue_dma source(%92 : memref<128xf32, #tpu.memory_space<any>>) target(%94 : memref<128xf32, #tpu.memory_space<vmem>>) target_semaphore(%96 : memref<!tpu.dma_semaphore, #tpu.memory_space<semaphore_mem>>)
      %c4_i32 = arith.constant 4 : i32
      %97 = arith.addi %56, %c4_i32 : i32
      %98 = arith.addi %52, %97 : i32
      %99 = arith.index_cast %98 : i32 to index
      %100 = memref.load %arg2[%99] : memref<48xi32, #tpu.memory_space<smem>>
      %c0_i32_45 = arith.constant 0 : i32
      %c0_i32_46 = arith.constant 0 : i32
      %c0_i32_47 = arith.constant 0 : i32
      %101 = tpu.memref_slice %arg3[%100, %c0_i32_47] : memref<64x128xf32, #tpu.memory_space<any>> -> memref<1x128xf32, #tpu.memory_space<any>>
      %102 = tpu.memref_squeeze %101 : memref<1x128xf32, #tpu.memory_space<any>> -> memref<128xf32, #tpu.memory_space<any>>
      %c0_i32_48 = arith.constant 0 : i32
      %103 = tpu.memref_slice %arg8[%c0_i32_45, %97, %c0_i32_48] : memref<2x8x128xf32, #tpu.memory_space<vmem>> -> memref<1x1x128xf32, #tpu.memory_space<vmem>>
      %104 = tpu.memref_squeeze %103 : memref<1x1x128xf32, #tpu.memory_space<vmem>> -> memref<128xf32, #tpu.memory_space<vmem>>
      %105 = tpu.memref_slice %arg9[%c0_i32_46] : memref<2x!tpu.dma_semaphore, #tpu.memory_space<semaphore_mem>> -> memref<1x!tpu.dma_semaphore, #tpu.memory_space<semaphore_mem>>
      %106 = tpu.memref_squeeze %105 : memref<1x!tpu.dma_semaphore, #tpu.memory_space<semaphore_mem>> -> memref<!tpu.dma_semaphore, #tpu.memory_space<semaphore_mem>>
      tpu.enqueue_dma source(%102 : memref<128xf32, #tpu.memory_space<any>>) target(%104 : memref<128xf32, #tpu.memory_space<vmem>>) target_semaphore(%106 : memref<!tpu.dma_semaphore, #tpu.memory_space<semaphore_mem>>)
      %c5_i32 = arith.constant 5 : i32
      %107 = arith.addi %56, %c5_i32 : i32
      %108 = arith.addi %52, %107 : i32
      %109 = arith.index_cast %108 : i32 to index
      %110 = memref.load %arg2[%109] : memref<48xi32, #tpu.memory_space<smem>>
      %c0_i32_49 = arith.constant 0 : i32
      %c0_i32_50 = arith.constant 0 : i32
      %c0_i32_51 = arith.constant 0 : i32
      %111 = tpu.memref_slice %arg3[%110, %c0_i32_51] : memref<64x128xf32, #tpu.memory_space<any>> -> memref<1x128xf32, #tpu.memory_space<any>>
      %112 = tpu.memref_squeeze %111 : memref<1x128xf32, #tpu.memory_space<any>> -> memref<128xf32, #tpu.memory_space<any>>
      %c0_i32_52 = arith.constant 0 : i32
      %113 = tpu.memref_slice %arg8[%c0_i32_49, %107, %c0_i32_52] : memref<2x8x128xf32, #tpu.memory_space<vmem>> -> memref<1x1x128xf32, #tpu.memory_space<vmem>>
      %114 = tpu.memref_squeeze %113 : memref<1x1x128xf32, #tpu.memory_space<vmem>> -> memref<128xf32, #tpu.memory_space<vmem>>
      %115 = tpu.memref_slice %arg9[%c0_i32_50] : memref<2x!tpu.dma_semaphore, #tpu.memory_space<semaphore_mem>> -> memref<1x!tpu.dma_semaphore, #tpu.memory_space<semaphore_mem>>
      %116 = tpu.memref_squeeze %115 : memref<1x!tpu.dma_semaphore, #tpu.memory_space<semaphore_mem>> -> memref<!tpu.dma_semaphore, #tpu.memory_space<semaphore_mem>>
      tpu.enqueue_dma source(%112 : memref<128xf32, #tpu.memory_space<any>>) target(%114 : memref<128xf32, #tpu.memory_space<vmem>>) target_semaphore(%116 : memref<!tpu.dma_semaphore, #tpu.memory_space<semaphore_mem>>)
      %c6_i32 = arith.constant 6 : i32
      %117 = arith.addi %56, %c6_i32 : i32
      %118 = arith.addi %52, %117 : i32
      %119 = arith.index_cast %118 : i32 to index
      %120 = memref.load %arg2[%119] : memref<48xi32, #tpu.memory_space<smem>>
      %c0_i32_53 = arith.constant 0 : i32
      %c0_i32_54 = arith.constant 0 : i32
      %c0_i32_55 = arith.constant 0 : i32
      %121 = tpu.memref_slice %arg3[%120, %c0_i32_55] : memref<64x128xf32, #tpu.memory_space<any>> -> memref<1x128xf32, #tpu.memory_space<any>>
      %122 = tpu.memref_squeeze %121 : memref<1x128xf32, #tpu.memory_space<any>> -> memref<128xf32, #tpu.memory_space<any>>
      %c0_i32_56 = arith.constant 0 : i32
      %123 = tpu.memref_slice %arg8[%c0_i32_53, %117, %c0_i32_56] : memref<2x8x128xf32, #tpu.memory_space<vmem>> -> memref<1x1x128xf32, #tpu.memory_space<vmem>>
      %124 = tpu.memref_squeeze %123 : memref<1x1x128xf32, #tpu.memory_space<vmem>> -> memref<128xf32, #tpu.memory_space<vmem>>
      %125 = tpu.memref_slice %arg9[%c0_i32_54] : memref<2x!tpu.dma_semaphore, #tpu.memory_space<semaphore_mem>> -> memref<1x!tpu.dma_semaphore, #tpu.memory_space<semaphore_mem>>
      %126 = tpu.memref_squeeze %125 : memref<1x!tpu.dma_semaphore, #tpu.memory_space<semaphore_mem>> -> memref<!tpu.dma_semaphore, #tpu.memory_space<semaphore_mem>>
      tpu.enqueue_dma source(%122 : memref<128xf32, #tpu.memory_space<any>>) target(%124 : memref<128xf32, #tpu.memory_space<vmem>>) target_semaphore(%126 : memref<!tpu.dma_semaphore, #tpu.memory_space<semaphore_mem>>)
      %c7_i32 = arith.constant 7 : i32
      %127 = arith.addi %56, %c7_i32 : i32
      %128 = arith.addi %52, %127 : i32
      %129 = arith.index_cast %128 : i32 to index
      %130 = memref.load %arg2[%129] : memref<48xi32, #tpu.memory_space<smem>>
      %c0_i32_57 = arith.constant 0 : i32
      %c0_i32_58 = arith.constant 0 : i32
      %c0_i32_59 = arith.constant 0 : i32
      %131 = tpu.memref_slice %arg3[%130, %c0_i32_59] : memref<64x128xf32, #tpu.memory_space<any>> -> memref<1x128xf32, #tpu.memory_space<any>>
      %132 = tpu.memref_squeeze %131 : memref<1x128xf32, #tpu.memory_space<any>> -> memref<128xf32, #tpu.memory_space<any>>
      %c0_i32_60 = arith.constant 0 : i32
      %133 = tpu.memref_slice %arg8[%c0_i32_57, %127, %c0_i32_60] : memref<2x8x128xf32, #tpu.memory_space<vmem>> -> memref<1x1x128xf32, #tpu.memory_space<vmem>>
      %134 = tpu.memref_squeeze %133 : memref<1x1x128xf32, #tpu.memory_space<vmem>> -> memref<128xf32, #tpu.memory_space<vmem>>
      %135 = tpu.memref_slice %arg9[%c0_i32_58] : memref<2x!tpu.dma_semaphore, #tpu.memory_space<semaphore_mem>> -> memref<1x!tpu.dma_semaphore, #tpu.memory_space<semaphore_mem>>
      %136 = tpu.memref_squeeze %135 : memref<1x!tpu.dma_semaphore, #tpu.memory_space<semaphore_mem>> -> memref<!tpu.dma_semaphore, #tpu.memory_space<semaphore_mem>>
      tpu.enqueue_dma source(%132 : memref<128xf32, #tpu.memory_space<any>>) target(%134 : memref<128xf32, #tpu.memory_space<vmem>>) target_semaphore(%136 : memref<!tpu.dma_semaphore, #tpu.memory_space<semaphore_mem>>)
      %c1_i32_61 = arith.constant 1 : i32
    } else {
    }
    %c1_i32_1 = arith.constant 1 : i32
    %4 = arith.addi %arg1, %c1_i32_1 : i32
    %c3_i32 = arith.constant 3 : i32
    %5 = arith.cmpi slt, %4, %c3_i32 : i32
    %6 = arith.extui %5 : i1 to i32
    %c0_i32_2 = arith.constant 0 : i32
    %7 = arith.cmpi ne, %6, %c0_i32_2 : i32
    scf.if %7 {
      %c1_i32_21 = arith.constant 1 : i32
      %50 = arith.addi %arg1, %c1_i32_21 : i32
      %c1_i32_22 = arith.constant 1 : i32
      %51 = arith.subi %c1_i32_22, %0 : i32
      %c24_i32 = arith.constant 24 : i32
      %52 = arith.muli %arg0, %c24_i32 : i32
      %c8_i32_23 = arith.constant 8 : i32
      %53 = arith.muli %50, %c8_i32_23 : i32
      %54 = arith.addi %52, %53 : i32
      %55 = tpu.assume_multiple %54, 8 : i32
      %c0_i32_24 = arith.constant 0 : i32
      %c1_i32_25 = arith.constant 1 : i32
      %56 = arith.muli %c0_i32_24, %c1_i32_25 : i32
      %c0_i32_26 = arith.constant 0 : i32
      %57 = arith.addi %c0_i32_26, %56 : i32
      %c8_i32_27 = arith.constant 8 : i32
      %58 = arith.muli %57, %c8_i32_27 : i32
      %59 = tpu.assume_multiple %58, 8 : i32
      %c0_i32_28 = arith.constant 0 : i32
      %60 = arith.addi %59, %c0_i32_28 : i32
      %61 = arith.addi %55, %60 : i32
      %62 = arith.index_cast %61 : i32 to index
      %63 = memref.load %arg2[%62] : memref<48xi32, #tpu.memory_space<smem>>
      %c0_i32_29 = arith.constant 0 : i32
      %64 = tpu.memref_slice %arg3[%63, %c0_i32_29] : memref<64x128xf32, #tpu.memory_space<any>> -> memref<1x128xf32, #tpu.memory_space<any>>
      %65 = tpu.memref_squeeze %64 : memref<1x128xf32, #tpu.memory_space<any>> -> memref<128xf32, #tpu.memory_space<any>>
      %c0_i32_30 = arith.constant 0 : i32
      %66 = tpu.memref_slice %arg8[%51, %60, %c0_i32_30] : memref<2x8x128xf32, #tpu.memory_space<vmem>> -> memref<1x1x128xf32, #tpu.memory_space<vmem>>
      %67 = tpu.memref_squeeze %66 : memref<1x1x128xf32, #tpu.memory_space<vmem>> -> memref<128xf32, #tpu.memory_space<vmem>>
      %68 = tpu.memref_slice %arg9[%51] : memref<2x!tpu.dma_semaphore, #tpu.memory_space<semaphore_mem>> -> memref<1x!tpu.dma_semaphore, #tpu.memory_space<semaphore_mem>>
      %69 = tpu.memref_squeeze %68 : memref<1x!tpu.dma_semaphore, #tpu.memory_space<semaphore_mem>> -> memref<!tpu.dma_semaphore, #tpu.memory_space<semaphore_mem>>
      tpu.enqueue_dma source(%65 : memref<128xf32, #tpu.memory_space<any>>) target(%67 : memref<128xf32, #tpu.memory_space<vmem>>) target_semaphore(%69 : memref<!tpu.dma_semaphore, #tpu.memory_space<semaphore_mem>>)
      %c1_i32_31 = arith.constant 1 : i32
      %70 = arith.addi %59, %c1_i32_31 : i32
      %71 = arith.addi %55, %70 : i32
      %72 = arith.index_cast %71 : i32 to index
      %73 = memref.load %arg2[%72] : memref<48xi32, #tpu.memory_space<smem>>
      %c0_i32_32 = arith.constant 0 : i32
      %74 = tpu.memref_slice %arg3[%73, %c0_i32_32] : memref<64x128xf32, #tpu.memory_space<any>> -> memref<1x128xf32, #tpu.memory_space<any>>
      %75 = tpu.memref_squeeze %74 : memref<1x128xf32, #tpu.memory_space<any>> -> memref<128xf32, #tpu.memory_space<any>>
      %c0_i32_33 = arith.constant 0 : i32
      %76 = tpu.memref_slice %arg8[%51, %70, %c0_i32_33] : memref<2x8x128xf32, #tpu.memory_space<vmem>> -> memref<1x1x128xf32, #tpu.memory_space<vmem>>
      %77 = tpu.memref_squeeze %76 : memref<1x1x128xf32, #tpu.memory_space<vmem>> -> memref<128xf32, #tpu.memory_space<vmem>>
      %78 = tpu.memref_slice %arg9[%51] : memref<2x!tpu.dma_semaphore, #tpu.memory_space<semaphore_mem>> -> memref<1x!tpu.dma_semaphore, #tpu.memory_space<semaphore_mem>>
      %79 = tpu.memref_squeeze %78 : memref<1x!tpu.dma_semaphore, #tpu.memory_space<semaphore_mem>> -> memref<!tpu.dma_semaphore, #tpu.memory_space<semaphore_mem>>
      tpu.enqueue_dma source(%75 : memref<128xf32, #tpu.memory_space<any>>) target(%77 : memref<128xf32, #tpu.memory_space<vmem>>) target_semaphore(%79 : memref<!tpu.dma_semaphore, #tpu.memory_space<semaphore_mem>>)
      %c2_i32 = arith.constant 2 : i32
      %80 = arith.addi %59, %c2_i32 : i32
      %81 = arith.addi %55, %80 : i32
      %82 = arith.index_cast %81 : i32 to index
      %83 = memref.load %arg2[%82] : memref<48xi32, #tpu.memory_space<smem>>
      %c0_i32_34 = arith.constant 0 : i32
      %84 = tpu.memref_slice %arg3[%83, %c0_i32_34] : memref<64x128xf32, #tpu.memory_space<any>> -> memref<1x128xf32, #tpu.memory_space<any>>
      %85 = tpu.memref_squeeze %84 : memref<1x128xf32, #tpu.memory_space<any>> -> memref<128xf32, #tpu.memory_space<any>>
      %c0_i32_35 = arith.constant 0 : i32
      %86 = tpu.memref_slice %arg8[%51, %80, %c0_i32_35] : memref<2x8x128xf32, #tpu.memory_space<vmem>> -> memref<1x1x128xf32, #tpu.memory_space<vmem>>
      %87 = tpu.memref_squeeze %86 : memref<1x1x128xf32, #tpu.memory_space<vmem>> -> memref<128xf32, #tpu.memory_space<vmem>>
      %88 = tpu.memref_slice %arg9[%51] : memref<2x!tpu.dma_semaphore, #tpu.memory_space<semaphore_mem>> -> memref<1x!tpu.dma_semaphore, #tpu.memory_space<semaphore_mem>>
      %89 = tpu.memref_squeeze %88 : memref<1x!tpu.dma_semaphore, #tpu.memory_space<semaphore_mem>> -> memref<!tpu.dma_semaphore, #tpu.memory_space<semaphore_mem>>
      tpu.enqueue_dma source(%85 : memref<128xf32, #tpu.memory_space<any>>) target(%87 : memref<128xf32, #tpu.memory_space<vmem>>) target_semaphore(%89 : memref<!tpu.dma_semaphore, #tpu.memory_space<semaphore_mem>>)
      %c3_i32_36 = arith.constant 3 : i32
      %90 = arith.addi %59, %c3_i32_36 : i32
      %91 = arith.addi %55, %90 : i32
      %92 = arith.index_cast %91 : i32 to index
      %93 = memref.load %arg2[%92] : memref<48xi32, #tpu.memory_space<smem>>
      %c0_i32_37 = arith.constant 0 : i32
      %94 = tpu.memref_slice %arg3[%93, %c0_i32_37] : memref<64x128xf32, #tpu.memory_space<any>> -> memref<1x128xf32, #tpu.memory_space<any>>
      %95 = tpu.memref_squeeze %94 : memref<1x128xf32, #tpu.memory_space<any>> -> memref<128xf32, #tpu.memory_space<any>>
      %c0_i32_38 = arith.constant 0 : i32
      %96 = tpu.memref_slice %arg8[%51, %90, %c0_i32_38] : memref<2x8x128xf32, #tpu.memory_space<vmem>> -> memref<1x1x128xf32, #tpu.memory_space<vmem>>
      %97 = tpu.memref_squeeze %96 : memref<1x1x128xf32, #tpu.memory_space<vmem>> -> memref<128xf32, #tpu.memory_space<vmem>>
      %98 = tpu.memref_slice %arg9[%51] : memref<2x!tpu.dma_semaphore, #tpu.memory_space<semaphore_mem>> -> memref<1x!tpu.dma_semaphore, #tpu.memory_space<semaphore_mem>>
      %99 = tpu.memref_squeeze %98 : memref<1x!tpu.dma_semaphore, #tpu.memory_space<semaphore_mem>> -> memref<!tpu.dma_semaphore, #tpu.memory_space<semaphore_mem>>
      tpu.enqueue_dma source(%95 : memref<128xf32, #tpu.memory_space<any>>) target(%97 : memref<128xf32, #tpu.memory_space<vmem>>) target_semaphore(%99 : memref<!tpu.dma_semaphore, #tpu.memory_space<semaphore_mem>>)
      %c4_i32 = arith.constant 4 : i32
      %100 = arith.addi %59, %c4_i32 : i32
      %101 = arith.addi %55, %100 : i32
      %102 = arith.index_cast %101 : i32 to index
      %103 = memref.load %arg2[%102] : memref<48xi32, #tpu.memory_space<smem>>
      %c0_i32_39 = arith.constant 0 : i32
      %104 = tpu.memref_slice %arg3[%103, %c0_i32_39] : memref<64x128xf32, #tpu.memory_space<any>> -> memref<1x128xf32, #tpu.memory_space<any>>
      %105 = tpu.memref_squeeze %104 : memref<1x128xf32, #tpu.memory_space<any>> -> memref<128xf32, #tpu.memory_space<any>>
      %c0_i32_40 = arith.constant 0 : i32
      %106 = tpu.memref_slice %arg8[%51, %100, %c0_i32_40] : memref<2x8x128xf32, #tpu.memory_space<vmem>> -> memref<1x1x128xf32, #tpu.memory_space<vmem>>
      %107 = tpu.memref_squeeze %106 : memref<1x1x128xf32, #tpu.memory_space<vmem>> -> memref<128xf32, #tpu.memory_space<vmem>>
      %108 = tpu.memref_slice %arg9[%51] : memref<2x!tpu.dma_semaphore, #tpu.memory_space<semaphore_mem>> -> memref<1x!tpu.dma_semaphore, #tpu.memory_space<semaphore_mem>>
      %109 = tpu.memref_squeeze %108 : memref<1x!tpu.dma_semaphore, #tpu.memory_space<semaphore_mem>> -> memref<!tpu.dma_semaphore, #tpu.memory_space<semaphore_mem>>
      tpu.enqueue_dma source(%105 : memref<128xf32, #tpu.memory_space<any>>) target(%107 : memref<128xf32, #tpu.memory_space<vmem>>) target_semaphore(%109 : memref<!tpu.dma_semaphore, #tpu.memory_space<semaphore_mem>>)
      %c5_i32 = arith.constant 5 : i32
      %110 = arith.addi %59, %c5_i32 : i32
      %111 = arith.addi %55, %110 : i32
      %112 = arith.index_cast %111 : i32 to index
      %113 = memref.load %arg2[%112] : memref<48xi32, #tpu.memory_space<smem>>
      %c0_i32_41 = arith.constant 0 : i32
      %114 = tpu.memref_slice %arg3[%113, %c0_i32_41] : memref<64x128xf32, #tpu.memory_space<any>> -> memref<1x128xf32, #tpu.memory_space<any>>
      %115 = tpu.memref_squeeze %114 : memref<1x128xf32, #tpu.memory_space<any>> -> memref<128xf32, #tpu.memory_space<any>>
      %c0_i32_42 = arith.constant 0 : i32
      %116 = tpu.memref_slice %arg8[%51, %110, %c0_i32_42] : memref<2x8x128xf32, #tpu.memory_space<vmem>> -> memref<1x1x128xf32, #tpu.memory_space<vmem>>
      %117 = tpu.memref_squeeze %116 : memref<1x1x128xf32, #tpu.memory_space<vmem>> -> memref<128xf32, #tpu.memory_space<vmem>>
      %118 = tpu.memref_slice %arg9[%51] : memref<2x!tpu.dma_semaphore, #tpu.memory_space<semaphore_mem>> -> memref<1x!tpu.dma_semaphore, #tpu.memory_space<semaphore_mem>>
      %119 = tpu.memref_squeeze %118 : memref<1x!tpu.dma_semaphore, #tpu.memory_space<semaphore_mem>> -> memref<!tpu.dma_semaphore, #tpu.memory_space<semaphore_mem>>
      tpu.enqueue_dma source(%115 : memref<128xf32, #tpu.memory_space<any>>) target(%117 : memref<128xf32, #tpu.memory_space<vmem>>) target_semaphore(%119 : memref<!tpu.dma_semaphore, #tpu.memory_space<semaphore_mem>>)
      %c6_i32 = arith.constant 6 : i32
      %120 = arith.addi %59, %c6_i32 : i32
      %121 = arith.addi %55, %120 : i32
      %122 = arith.index_cast %121 : i32 to index
      %123 = memref.load %arg2[%122] : memref<48xi32, #tpu.memory_space<smem>>
      %c0_i32_43 = arith.constant 0 : i32
      %124 = tpu.memref_slice %arg3[%123, %c0_i32_43] : memref<64x128xf32, #tpu.memory_space<any>> -> memref<1x128xf32, #tpu.memory_space<any>>
      %125 = tpu.memref_squeeze %124 : memref<1x128xf32, #tpu.memory_space<any>> -> memref<128xf32, #tpu.memory_space<any>>
      %c0_i32_44 = arith.constant 0 : i32
      %126 = tpu.memref_slice %arg8[%51, %120, %c0_i32_44] : memref<2x8x128xf32, #tpu.memory_space<vmem>> -> memref<1x1x128xf32, #tpu.memory_space<vmem>>
      %127 = tpu.memref_squeeze %126 : memref<1x1x128xf32, #tpu.memory_space<vmem>> -> memref<128xf32, #tpu.memory_space<vmem>>
      %128 = tpu.memref_slice %arg9[%51] : memref<2x!tpu.dma_semaphore, #tpu.memory_space<semaphore_mem>> -> memref<1x!tpu.dma_semaphore, #tpu.memory_space<semaphore_mem>>
      %129 = tpu.memref_squeeze %128 : memref<1x!tpu.dma_semaphore, #tpu.memory_space<semaphore_mem>> -> memref<!tpu.dma_semaphore, #tpu.memory_space<semaphore_mem>>
      tpu.enqueue_dma source(%125 : memref<128xf32, #tpu.memory_space<any>>) target(%127 : memref<128xf32, #tpu.memory_space<vmem>>) target_semaphore(%129 : memref<!tpu.dma_semaphore, #tpu.memory_space<semaphore_mem>>)
      %c7_i32 = arith.constant 7 : i32
      %130 = arith.addi %59, %c7_i32 : i32
      %131 = arith.addi %55, %130 : i32
      %132 = arith.index_cast %131 : i32 to index
      %133 = memref.load %arg2[%132] : memref<48xi32, #tpu.memory_space<smem>>
      %c0_i32_45 = arith.constant 0 : i32
      %134 = tpu.memref_slice %arg3[%133, %c0_i32_45] : memref<64x128xf32, #tpu.memory_space<any>> -> memref<1x128xf32, #tpu.memory_space<any>>
      %135 = tpu.memref_squeeze %134 : memref<1x128xf32, #tpu.memory_space<any>> -> memref<128xf32, #tpu.memory_space<any>>
      %c0_i32_46 = arith.constant 0 : i32
      %136 = tpu.memref_slice %arg8[%51, %130, %c0_i32_46] : memref<2x8x128xf32, #tpu.memory_space<vmem>> -> memref<1x1x128xf32, #tpu.memory_space<vmem>>
      %137 = tpu.memref_squeeze %136 : memref<1x1x128xf32, #tpu.memory_space<vmem>> -> memref<128xf32, #tpu.memory_space<vmem>>
      %138 = tpu.memref_slice %arg9[%51] : memref<2x!tpu.dma_semaphore, #tpu.memory_space<semaphore_mem>> -> memref<1x!tpu.dma_semaphore, #tpu.memory_space<semaphore_mem>>
      %139 = tpu.memref_squeeze %138 : memref<1x!tpu.dma_semaphore, #tpu.memory_space<semaphore_mem>> -> memref<!tpu.dma_semaphore, #tpu.memory_space<semaphore_mem>>
      tpu.enqueue_dma source(%135 : memref<128xf32, #tpu.memory_space<any>>) target(%137 : memref<128xf32, #tpu.memory_space<vmem>>) target_semaphore(%139 : memref<!tpu.dma_semaphore, #tpu.memory_space<semaphore_mem>>)
      %c1_i32_47 = arith.constant 1 : i32
    } else {
    }
    %c0_i32_3 = arith.constant 0 : i32
    %c0_i32_4 = arith.constant 0 : i32
    %8 = tpu.memref_slice %arg3[%c0_i32_3, %c0_i32_4] : memref<64x128xf32, #tpu.memory_space<any>> -> memref<8x128xf32, #tpu.memory_space<any>>
    %c0_i32_5 = arith.constant 0 : i32
    %c0_i32_6 = arith.constant 0 : i32
    %9 = tpu.memref_slice %arg8[%0, %c0_i32_5, %c0_i32_6] : memref<2x8x128xf32, #tpu.memory_space<vmem>> -> memref<1x8x128xf32, #tpu.memory_space<vmem>>
    %10 = tpu.memref_squeeze %9 : memref<1x8x128xf32, #tpu.memory_space<vmem>> -> memref<8x128xf32, #tpu.memory_space<vmem>>
    %11 = tpu.memref_slice %arg9[%0] : memref<2x!tpu.dma_semaphore, #tpu.memory_space<semaphore_mem>> -> memref<1x!tpu.dma_semaphore, #tpu.memory_space<semaphore_mem>>
    %12 = tpu.memref_squeeze %11 : memref<1x!tpu.dma_semaphore, #tpu.memory_space<semaphore_mem>> -> memref<!tpu.dma_semaphore, #tpu.memory_space<semaphore_mem>>
    tpu.wait_dma2 semaphore(%12 : memref<!tpu.dma_semaphore, #tpu.memory_space<semaphore_mem>>) src(%8 : memref<8x128xf32, #tpu.memory_space<any>>) dst(%10 : memref<8x128xf32, #tpu.memory_space<vmem>>)
    %c8_i32 = arith.constant 8 : i32
    %13 = arith.muli %arg1, %c8_i32 : i32
    %14 = tpu.assume_multiple %13, 8 : i32
    %15 = arith.index_cast %14 : i32 to index
    %c0 = arith.constant 0 : index
    %16 = vector.load %arg4[%15, %c0] : memref<24x128xf32, #tpu.memory_space<vmem>>, vector<8x128xf32>
    %17 = arith.index_cast %0 : i32 to index
    %c0_7 = arith.constant 0 : index
    %c0_8 = arith.constant 0 : index
    %18 = vector.load %arg8[%17, %c0_7, %c0_8] : memref<2x8x128xf32, #tpu.memory_space<vmem>>, vector<1x8x128xf32>
    %19 = vector.shape_cast %18 : vector<1x8x128xf32> to vector<8x128xf32>
    %20 = arith.addf %19, %16 : vector<8x128xf32>
    %cst = arith.constant dense<0.000000e+00> : vector<8xf32>
    %21 = vector.multi_reduction <add>, %20, %cst [1] : vector<8x128xf32> to vector<8xf32>
    %22 = vector.shape_cast %21 : vector<8xf32> to vector<8x1xf32>
    %23 = arith.mulf %20, %20 : vector<8x128xf32>
    %cst_9 = arith.constant dense<0.000000e+00> : vector<8xf32>
    %24 = vector.multi_reduction <add>, %23, %cst_9 [1] : vector<8x128xf32> to vector<8xf32>
    %25 = vector.shape_cast %24 : vector<8xf32> to vector<8x1xf32>
    %cst_10 = arith.constant 7.812500e-03 : f32
    %26 = vector.broadcast %cst_10 : f32 to vector<8x1xf32>
    %27 = arith.mulf %22, %26 : vector<8x1xf32>
    %cst_11 = arith.constant 7.812500e-03 : f32
    %28 = vector.broadcast %cst_11 : f32 to vector<8x1xf32>
    %29 = arith.mulf %25, %28 : vector<8x1xf32>
    %30 = arith.mulf %27, %27 : vector<8x1xf32>
    %31 = arith.subf %29, %30 : vector<8x1xf32>
    %cst_12 = arith.constant 0.000000e+00 : f32
    %32 = vector.broadcast %cst_12 : f32 to vector<8x1xf32>
    %33 = arith.maximumf %31, %32 : vector<8x1xf32>
    %cst_13 = arith.constant 9.99999996E-13 : f32
    %34 = vector.broadcast %cst_13 : f32 to vector<8x1xf32>
    %35 = arith.addf %33, %34 : vector<8x1xf32>
    %36 = math.rsqrt %35 : vector<8x1xf32>
    %c0_14 = arith.constant 0 : index
    %c0_15 = arith.constant 0 : index
    %37 = vector.load %arg5[%c0_14, %c0_15] : memref<1x128xf32, #tpu.memory_space<vmem>>, vector<1x128xf32>
    %c0_16 = arith.constant 0 : index
    %c0_17 = arith.constant 0 : index
    %38 = vector.load %arg6[%c0_16, %c0_17] : memref<1x128xf32, #tpu.memory_space<vmem>>, vector<1x128xf32>
    %39 = vector.broadcast %27 : vector<8x1xf32> to vector<8x128xf32>
    %40 = arith.subf %20, %39 : vector<8x128xf32>
    %41 = vector.broadcast %36 : vector<8x1xf32> to vector<8x128xf32>
    %42 = arith.mulf %40, %41 : vector<8x128xf32>
    %43 = vector.broadcast %37 : vector<1x128xf32> to vector<8x128xf32>
    %44 = arith.mulf %42, %43 : vector<8x128xf32>
    %45 = vector.broadcast %38 : vector<1x128xf32> to vector<8x128xf32>
    %46 = arith.addf %44, %45 : vector<8x128xf32>
    %c0_18 = arith.constant 0 : index
    %c0_19 = arith.constant 0 : index
    %c0_20 = arith.constant 0 : index
    %47 = vector.load %arg7[%c0_18, %c0_19, %c0_20] : memref<1x8x128xf32, #tpu.memory_space<vmem>>, vector<1x8x128xf32>
    %48 = vector.shape_cast %47 : vector<1x8x128xf32> to vector<8x128xf32>
    %49 = vector.shape_cast %46 : vector<8x128xf32> to vector<1x8x128xf32>
    tpu.vector_store %arg7[%c0_18, %c0_19, %c0_20], %49 {strides = array<i32>} : memref<1x8x128xf32, #tpu.memory_space<vmem>>, vector<1x8x128xf32>,
    return
  }
  func.func @transform_1(%arg0: i32, %arg1: i32, %arg2: memref<48xi32, #tpu.memory_space<smem>>) -> (i32, i32) {
    %c0_i32 = arith.constant 0 : i32
    %c0_i32_0 = arith.constant 0 : i32
    %c0_i32_1 = arith.constant 0 : i32
    return %c0_i32, %c0_i32_0 : i32, i32
  }
  func.func @transform_2(%arg0: i32, %arg1: i32, %arg2: memref<48xi32, #tpu.memory_space<smem>>) -> (i32, i32) {
    %c0_i32 = arith.constant 0 : i32
    %c0_i32_0 = arith.constant 0 : i32
    %c0_i32_1 = arith.constant 0 : i32
    return %c0_i32, %c0_i32_0 : i32, i32
  }
  func.func @transform_3(%arg0: i32, %arg1: i32, %arg2: memref<48xi32, #tpu.memory_space<smem>>) -> (i32, i32) {
    %c0_i32 = arith.constant 0 : i32
    %c0_i32_0 = arith.constant 0 : i32
    %c0_i32_1 = arith.constant 0 : i32
    return %c0_i32, %c0_i32_0 : i32, i32
  }
  func.func @transform_4(%arg0: i32, %arg1: i32, %arg2: memref<48xi32, #tpu.memory_space<smem>>) -> (i32, i32, i32) {
    %c0_i32 = arith.constant 0 : i32
    %c0_i32_0 = arith.constant 0 : i32
    return %arg0, %arg1, %c0_i32 : i32, i32, i32
  }
}

</mosaic_0001>

<bundles_post_ra>
// kernel: tpu_custom_call.1
= control target key start
LH: loop header
LB: loop body
LE: loop exit
PB: predicated region body
PF: predicated region fallthrough
CT: control target
= control target key end

     0   :  { %s1349_s18 = smov [#allocation5]   ;;  %s1952_s0 = inlined_call_operand.hbm [shape: s32[48], index: 0, kind: input, shape index: {}]   ;;  %s1953_s1 = inlined_call_operand.hbm [shape: f32[64,128], index: 1, kind: input, shape index: {}]   ;;  %s1954_s2 = inlined_call_operand.hbm [shape: f32[24,128], index: 2, kind: input, shape index: {}]   ;;  %s1955_s3 = inlined_call_operand.vmem [shape: f32[1,128], index: 3, kind: input, shape index: {}]   ;;  %s1956_s4 = inlined_call_operand.vmem [shape: f32[1,128], index: 4, kind: input, shape index: {}]   ;;  %s1957_s5 = inlined_call_operand.vmem [shape: f32[2,20,128], index: 5, kind: output, shape index: {}]  }
   0x1   :  { %1959 = sst [smem:[#allocation63_spill]] %s1954_s2 }
   0x2   :  { %1960 = sst [smem:[#allocation64_spill]] %s1957_s5 }
   0x3   :  { %11 = dma.hbm_to_smem %s1952_s0, 16, %s1349_s18, [#allocation4] }
   0x4   :  { %1321 = dma.done.wait [#allocation4], 16 }
   0x5   :  { %1322 = vsyncadd [#allocation4], 4294967280 }
   0x6   :  { %13 = sfence }
   0x7   :  { %14 = vsyncpa [#allocation7], 0  ;;  %s1394_s21 = smov 0   ;;  %s1396_s22 = smov 0  }
   0x8   :  { %s1398_s23 = smov 0   ;;  %s1400_s24 = smov 0  }
   0x9   :  { %s1402_s25 = smov 0  }
   0xa LB: > { %s690_s0 = sadd.s32 4294967295, %s1347_s25   ;;  %s29_s26 = sadd.s32 1, %s1339_s23  ;;  %s1347_s25 = sphi %s1402_s25, %s20_s25   ;;  %s1343_s24 = sphi %s1400_s24, %s1976_s24   ;;  %s1339_s23 = sphi %s1398_s23, %s1975_s23   ;;  %s1335_s22 = sphi %s1396_s22, %s1974_s22   ;;  %s1331_s21 = sphi %s1394_s21, %s1973_s21  }
   0xb   : > { %p30_p0 = scmp.ge.s32.totalorder %s29_s26, 3  ;;  %s32_s27 = sadd.s32 1, %s1343_s24 }
   0xc   : > { %p692_p1 = scmp.ge.s32.totalorder %s1347_s25, 1  ;;  %p128_p2 = scmp.lt.s32.totalorder %s1347_s25, 7 }
   0xd   : > { %s1978_s26 = smov (%p30_p0, %s29_s26), 0  ;;  %s1980_s27 = smov (!%p30_p0, %s32_s27), %s1343_s24 }
   0xe   : > { %1961 = sst [smem:[#allocation61_spill]] %s1978_s26  ;;  %p1427_p3 = pnand %p692_p1, %p128_p2 }
   0xf   : > { %p34_p4 = scmp.ge.s32.totalorder %s1980_s27, 2  ;;  %p1431_p5 = scmp.eq.s32.totalorder %s690_s0, 0 }
  0x10   : > { %p789_p6 = pneg %p1427_p3  ;;  %s1350_s30 = smov [#allocation6]  }
  0x11   : > { %s1982_s27 = smov (%p34_p4, %s1980_s27), 0  ;;  %s140_s6 = sshll.u32 %s1350_s30, 4  ;;  %s141_s6 = int_to_ptr.vmem [resolvable:$true] %s140_s6 }
  0x12   : > { %1964 = sst [smem:[#allocation62_spill]] %s1982_s27  ;;  %p1441_p7 = pnand %p1431_p5, %p789_p6 }
  0x13   : > { %s870_s8 = scalar_lea.vmem %s141_s6, 384  ;;  %p878_p12 = scmp.lt.s32.totalorder %s141_s6, %s141_s6 }
  0x14   : > { %p861_p8 = pneg %p1441_p7  ;;  %p871_p9 = scmp.ne.s32.totalorder %s141_s6, %s870_s8 }
  0x15   : > { %p879_p13 = scmp.lt.s32.totalorder %s870_s8, %s870_s8 }
  0x16   : > { %p873_p10 = pnand %p871_p9, %p861_p8 }
  0x17   : > { %p880_p0 = por %p879_p13, %p878_p12 }
  0x18   : > { %p874_p11 = pneg %p873_p10 }
  0x1a   : > { %p881_p1 = pnand %p880_p0, %p874_p11 }
  0x1c   : > { %884 = shalt.err (!%p881_p1)
}
  0x1d   : > { %s1351_s9 = smov 128   ;;  %s1352_s10 = smov 8  }
  0x1e   : > { %s1966_s2 = sld [smem:[#allocation63_spill]] }
  0x20   : > { %162 = sbr.rel (%p1427_p3) target bundleno = 641 (0x281), region = 32 }
  0x24   : > { %792 = dma.hbm_to_vmem [thread:$0]  (!%p1441_p7), %s1966_s2, 384, %s141_s6, [#allocation7], %s1351_s9, %s1351_s9, %s1352_s10  }
  0x25   : > { %1324 = dma.done.wait (%p1431_p5), [#allocation7], 384  }
  0x26   : > { %1326 = vsyncadd (%p1431_p5), [#allocation7], 4294966912  ;;  %p184_p2 = scmp.lt.s32.totalorder %s1335_s22, 1  ;;  %p186_p4 = scmp.lt.s32.totalorder %s1331_s21, 2 }
  0x27   : > { %p795_p6 = scmp.eq.s32.totalorder %s1331_s21, 0  ;;  %s1464_s16 = smul.u32 24, %s1335_s22 }
  0x28   : > { %s185_s13 = scalar_select %p184_p2, %s1335_s22, 1 }
  0x29   : > { %s187_s14 = scalar_select %p186_p4, %s1331_s21, 2 }
  0x2a   : > { %s734_s15 = smul.u32 3, %s185_s13  ;;  %s1353_s17 = smov [#allocation2]  }
  0x2b   : > { %s209_s18 = sshll.u32 %s1353_s17, 4  ;;  %s214_s0 = sadd.s32 1, %s1464_s16  ;;  %s1466_s18 = int_to_ptr.vmem [resolvable:$true] %s209_s18 }
  0x2c   : > { %s189_s19 = sadd.s32 %s734_s15, %s187_s14  ;;  %s1967_s5 = sld [smem:[#allocation64_spill]] }
  0x2d   : > { %s696_s20 = sshll.u32 %s189_s19, 3  ;;  %s1354_s9 = smov [#allocation2 + $0x1]  }
  0x2e   : > { %s740_s22 = scalar_select %p795_p6, [#allocation5], [#allocation42] }
  0x2f   : > { %s741_s6 = scalar_select %p795_p6, %s1464_s16, 0 }
  0x30   : > { %s743_s7 = scalar_select %p795_p6, [#allocation5], [#allocation43] }
  0x31   : > { %s199_s8 = sld [smem:[%s740_s22 + %s741_s6]]  ;;  %s226_s10 = sshll.u32 %s1354_s9, 4  ;;  %s1483_s10 = int_to_ptr.vmem [resolvable:$true] %s226_s10 }
  0x32   : > { %s1472_s30 = scalar_lea.vmem %s1967_s5, %s696_s20  ;;  %s1984_s0 = smov (!%p795_p6, %s214_s0), 0 }
  0x33   : > { %s231_s11 = sadd.s32 2, %s1464_s16  ;;  %s1486_s12 = sld [smem:[%s743_s7 + %s1984_s0]] }
  0x34   : > { %s746_s13 = scalar_select %p795_p6, [#allocation5], [#allocation44] }
  0x35   : > { %s1986_s11 = smov (!%p795_p6, %s231_s11), 0  ;;  %s1355_s15 = smov [#allocation2 + $0x2]  }
  0x36   : > { %s243_s17 = sshll.u32 %s1355_s15, 4  ;;  %s1495_s29 = sld [smem:[%s746_s13 + %s1986_s11]]  ;;  %s1522_s17 = int_to_ptr.vmem [resolvable:$true] %s243_s17 }
  0x37   : > { %s698_s14 = sshll.u32 %s199_s8, 4  ;;  %s1502_s7 = scalar_lea.hbm %s1953_s1, 1024 }
  0x38   : > { %s201_s28 = scalar_lea.hbm %s1953_s1, %s698_s14 }
  0x39   : > { %s885_s22 = scalar_lea.hbm %s201_s28, 16  ;;  %p890_p8 = scmp.lt.s32.totalorder %s201_s28, %s1953_s1 }
  0x3a   : > { %p886_p3 = scmp.ne.s32.totalorder %s201_s28, %s885_s22  ;;  %p891_p9 = scmp.lt.s32.totalorder %s1502_s7, %s885_s22 }
  0x3c   : > { %p887_p5 = pnand %p886_p3, %p795_p6  ;;  %p892_p10 = por %p891_p9, %p890_p8 }
  0x3e   : > { %p888_p7 = pneg %p887_p5 }
  0x40   : > { %p893_p11 = pnand %p892_p10, %p888_p7 }
  0x42   : > { %896 = shalt.err (!%p893_p11)  }
  0x43   : > { %s897_s11 = scalar_lea.vmem %s1466_s18, 16  ;;  %s1513_s13 = scalar_lea.vmem %s1466_s18, 256 }
  0x44   : > { %p898_p12 = scmp.ne.s32.totalorder %s1466_s18, %s897_s11  ;;  %p904_p1 = scmp.lt.s32.totalorder %s1466_s18, %s1466_s18 }
  0x45   : > { %p905_p2 = scmp.lt.s32.totalorder %s1513_s13, %s897_s11 }
  0x46   : > { %p899_p13 = pnand %p898_p12, %p795_p6 }
  0x47   : > { %p906_p4 = por %p905_p2, %p904_p1 }
  0x48   : > { %p900_p0 = pneg %p899_p13 }
  0x4a   : > { %p907_p3 = pnand %p906_p4, %p900_p0 }
  0x4c   : > { %910 = shalt.err (!%p907_p3)  }
  0x4d   : > { %742 = dma.hbm_to_vmem [thread:$0]  (%p795_p6), %s201_s28, 16, %s1466_s18, [#allocation3] }
  0x4e   : > { %s699_s14 = sshll.u32 %s1486_s12, 4  ;;  %s248_s22 = sadd.s32 3, %s1464_s16 }
  0x4f   : > { %s217_s20 = scalar_lea.hbm %s1953_s1, %s699_s14 }
  0x50   : > { %s911_s0 = scalar_lea.hbm %s217_s20, 16  ;;  %p916_p9 = scmp.lt.s32.totalorder %s217_s20, %s1953_s1 }
  0x51   : > { %p912_p5 = scmp.ne.s32.totalorder %s217_s20, %s911_s0  ;;  %p917_p10 = scmp.lt.s32.totalorder %s1502_s7, %s911_s0 }
  0x53   : > { %p913_p7 = pnand %p912_p5, %p795_p6  ;;  %p918_p11 = por %p917_p10, %p916_p9 }
  0x55   : > { %p914_p8 = pneg %p913_p7 }
  0x57   : > { %p919_p12 = pnand %p918_p11, %p914_p8 }
  0x59   : > { %922 = shalt.err (!%p919_p12)  }
  0x5a   : > { %s923_s12 = scalar_lea.vmem %s1483_s10, 16  ;;  %p930_p2 = scmp.lt.s32.totalorder %s1483_s10, %s1466_s18 }
  0x5b   : > { %p924_p13 = scmp.ne.s32.totalorder %s1483_s10, %s923_s12  ;;  %p931_p4 = scmp.lt.s32.totalorder %s1513_s13, %s923_s12 }
  0x5d   : > { %p925_p0 = pnand %p924_p13, %p795_p6  ;;  %p932_p3 = por %p931_p4, %p930_p2 }
  0x5f   : > { %p926_p1 = pneg %p925_p0 }
  0x61   : > { %p933_p5 = pnand %p932_p3, %p926_p1 }
  0x63   : > { %936 = shalt.err (!%p933_p5)  }
  0x64   : > { %745 = dma.hbm_to_vmem [thread:$0]  (%p795_p6), %s217_s20, 16, %s1483_s10, [#allocation3] }
  0x65   : > { %s749_s28 = scalar_select %p795_p6, [#allocation5], [#allocation45] }
  0x66   : > { %s700_s8 = sshll.u32 %s1495_s29, 4  ;;  %s1356_s19 = smov [#allocation2 + $0x3]  }
  0x67   : > { %s234_s15 = scalar_lea.hbm %s1953_s1, %s700_s8  ;;  %s260_s0 = sshll.u32 %s1356_s19, 4  ;;  %s1570_s0 = int_to_ptr.vmem [resolvable:$true] %s260_s0 }
  0x68   : > { %s937_s6 = scalar_lea.hbm %s234_s15, 16  ;;  %p942_p10 = scmp.lt.s32.totalorder %s234_s15, %s1953_s1 }
  0x69   : > { %p938_p7 = scmp.ne.s32.totalorder %s234_s15, %s937_s6  ;;  %p943_p11 = scmp.lt.s32.totalorder %s1502_s7, %s937_s6 }
  0x6b   : > { %p939_p8 = pnand %p938_p7, %p795_p6  ;;  %p944_p12 = por %p943_p11, %p942_p10 }
  0x6d   : > { %p940_p9 = pneg %p939_p8 }
  0x6f   : > { %p945_p13 = pnand %p944_p12, %p940_p9 }
  0x71   : > { %948 = shalt.err (!%p945_p13)  }
  0x72   : > { %s949_s10 = scalar_lea.vmem %s1522_s17, 16  ;;  %p956_p4 = scmp.lt.s32.totalorder %s1522_s17, %s1466_s18 }
  0x73   : > { %p950_p0 = scmp.ne.s32.totalorder %s1522_s17, %s949_s10  ;;  %p957_p3 = scmp.lt.s32.totalorder %s1513_s13, %s949_s10 }
  0x75   : > { %p951_p1 = pnand %p950_p0, %p795_p6  ;;  %p958_p5 = por %p957_p3, %p956_p4 }
  0x77   : > { %p952_p2 = pneg %p951_p1 }
  0x79   : > { %p959_p7 = pnand %p958_p5, %p952_p2 }
  0x7b   : > { %962 = shalt.err (!%p959_p7)  }
  0x7c   : > { %748 = dma.hbm_to_vmem [thread:$0]  (%p795_p6), %s234_s15, 16, %s1522_s17, [#allocation3] }
  0x7d   : > { %s1988_s22 = smov (!%p795_p6, %s248_s22), 0  ;;  %s265_s29 = sadd.s32 4, %s1464_s16 }
  0x7e   : > { %s249_s20 = sld [smem:[%s749_s28 + %s1988_s22]]  ;;  %s1990_s29 = smov (!%p795_p6, %s265_s29), 0 }
  0x7f   : > { %s752_s8 = scalar_select %p795_p6, [#allocation5], [#allocation46] }
  0x80   : > { %s1357_s11 = smov [#allocation2 + $0x4]   ;;  %s282_s19 = sadd.s32 5, %s1464_s16 }
  0x81   : > { %s277_s14 = sshll.u32 %s1357_s11, 4  ;;  %s1578_s6 = sld [smem:[%s752_s8 + %s1990_s29]]  ;;  %s1580_s14 = int_to_ptr.vmem [resolvable:$true] %s277_s14 }
  0x82   : > { %s755_s17 = scalar_select %p795_p6, [#allocation5], [#allocation47] }
  0x83   : > { %s1358_s22 = smov [#allocation2 + $0x5]  }
  0x84   : > { %s701_s15 = sshll.u32 %s249_s20, 4  ;;  %s294_s28 = sshll.u32 %s1358_s22, 4  ;;  %s1606_s28 = int_to_ptr.vmem [resolvable:$true] %s294_s28 }
  0x85   : > { %s251_s10 = scalar_lea.hbm %s1953_s1, %s701_s15 }
  0x86   : > { %s963_s2 = scalar_lea.hbm %s251_s10, 16  ;;  %p968_p11 = scmp.lt.s32.totalorder %s251_s10, %s1953_s1 }
  0x87   : > { %p964_p8 = scmp.ne.s32.totalorder %s251_s10, %s963_s2  ;;  %p969_p12 = scmp.lt.s32.totalorder %s1502_s7, %s963_s2 }
  0x89   : > { %p965_p9 = pnand %p964_p8, %p795_p6  ;;  %p970_p13 = por %p969_p12, %p968_p11 }
  0x8b   : > { %p966_p10 = pneg %p965_p9 }
  0x8d   : > { %p971_p0 = pnand %p970_p13, %p966_p10 }
  0x8f   : > { %974 = shalt.err (!%p971_p0)  }
  0x90   : > { %s975_s29 = scalar_lea.vmem %s1570_s0, 16  ;;  %p982_p3 = scmp.lt.s32.totalorder %s1570_s0, %s1466_s18 }
  0x91   : > { %p976_p1 = scmp.ne.s32.totalorder %s1570_s0, %s975_s29  ;;  %p983_p5 = scmp.lt.s32.totalorder %s1513_s13, %s975_s29 }
  0x93   : > { %p977_p2 = pnand %p976_p1, %p795_p6  ;;  %p984_p7 = por %p983_p5, %p982_p3 }
  0x95   : > { %p978_p4 = pneg %p977_p2 }
  0x97   : > { %p985_p8 = pnand %p984_p7, %p978_p4 }
  0x99   : > { %988 = shalt.err (!%p985_p8)  }
  0x9a   : > { %751 = dma.hbm_to_vmem [thread:$0]  (%p795_p6), %s251_s10, 16, %s1570_s0, [#allocation3] }
  0x9b   : > { %s1992_s19 = smov (!%p795_p6, %s282_s19), 0  ;;  %s702_s2 = sshll.u32 %s1578_s6, 4 }
  0x9c   : > { %s268_s8 = scalar_lea.hbm %s1953_s1, %s702_s2  ;;  %s1611_s15 = sld [smem:[%s755_s17 + %s1992_s19]] }
  0x9d   : > { %s989_s9 = scalar_lea.hbm %s268_s8, 16  ;;  %p994_p12 = scmp.lt.s32.totalorder %s268_s8, %s1953_s1 }
  0x9e   : > { %p990_p9 = scmp.ne.s32.totalorder %s268_s8, %s989_s9  ;;  %p995_p13 = scmp.lt.s32.totalorder %s1502_s7, %s989_s9 }
  0xa0   : > { %p991_p10 = pnand %p990_p9, %p795_p6  ;;  %p996_p0 = por %p995_p13, %p994_p12 }
  0xa2   : > { %p992_p11 = pneg %p991_p10 }
  0xa4   : > { %p997_p1 = pnand %p996_p0, %p992_p11 }
  0xa6   : > { %1000 = shalt.err (!%p997_p1)  }
  0xa7   : > { %s1001_s0 = scalar_lea.vmem %s1580_s14, 16  ;;  %p1008_p5 = scmp.lt.s32.totalorder %s1580_s14, %s1466_s18 }
  0xa8   : > { %p1002_p2 = scmp.ne.s32.totalorder %s1580_s14, %s1001_s0  ;;  %p1009_p7 = scmp.lt.s32.totalorder %s1513_s13, %s1001_s0 }
  0xaa   : > { %p1003_p4 = pnand %p1002_p2, %p795_p6  ;;  %p1010_p8 = por %p1009_p7, %p1008_p5 }
  0xac   : > { %p1004_p3 = pneg %p1003_p4 }
  0xae   : > { %p1011_p9 = pnand %p1010_p8, %p1004_p3 }
  0xb0   : > { %1014 = shalt.err (!%p1011_p9)  }
  0xb1   : > { %754 = dma.hbm_to_vmem [thread:$0]  (%p795_p6), %s268_s8, 16, %s1580_s14, [#allocation3] }
  0xb2   : > { %s299_s19 = sadd.s32 6, %s1464_s16  ;;  %s1359_s17 = smov [#allocation2 + $0x6]  }
  0xb3   : > { %s758_s6 = scalar_select %p795_p6, [#allocation5], [#allocation48] }
  0xb4   : > { %s1994_s19 = smov (!%p795_p6, %s299_s19), 0  ;;  %s311_s10 = sshll.u32 %s1359_s17, 4  ;;  %s1639_s10 = int_to_ptr.vmem [resolvable:$true] %s311_s10 }
  0xb5   : > { %s316_s11 = sadd.s32 7, %s1464_s16  ;;  %s703_s29 = sshll.u32 %s1611_s15, 4 }
  0xb6   : > { %s300_s2 = sld [smem:[%s758_s6 + %s1994_s19]]  ;;  %s285_s9 = scalar_lea.hbm %s1953_s1, %s703_s29 }
  0xb7   : > { %s1015_s12 = scalar_lea.hbm %s285_s9, 16  ;;  %p1020_p13 = scmp.lt.s32.totalorder %s285_s9, %s1953_s1 }
  0xb8   : > { %p1016_p10 = scmp.ne.s32.totalorder %s285_s9, %s1015_s12  ;;  %p1021_p0 = scmp.lt.s32.totalorder %s1502_s7, %s1015_s12 }
  0xba   : > { %p1017_p11 = pnand %p1016_p10, %p795_p6  ;;  %p1022_p1 = por %p1021_p0, %p1020_p13 }
  0xbc   : > { %p1018_p12 = pneg %p1017_p11 }
  0xbe   : > { %p1023_p2 = pnand %p1022_p1, %p1018_p12 }
  0xc0   : > { %1026 = shalt.err (!%p1023_p2)  }
  0xc1   : > { %s1027_s15 = scalar_lea.vmem %s1606_s28, 16  ;;  %p1034_p7 = scmp.lt.s32.totalorder %s1606_s28, %s1466_s18 }
  0xc2   : > { %p1028_p4 = scmp.ne.s32.totalorder %s1606_s28, %s1027_s15  ;;  %p1035_p8 = scmp.lt.s32.totalorder %s1513_s13, %s1027_s15 }
  0xc4   : > { %p1029_p3 = pnand %p1028_p4, %p795_p6  ;;  %p1036_p9 = por %p1035_p8, %p1034_p7 }
  0xc6   : > { %p1030_p5 = pneg %p1029_p3 }
  0xc8   : > { %p1037_p10 = pnand %p1036_p9, %p1030_p5 }
  0xca   : > { %1040 = shalt.err (!%p1037_p10)  }
  0xcb   : > { %757 = dma.hbm_to_vmem [thread:$0]  (%p795_p6), %s285_s9, 16, %s1606_s28, [#allocation3] }
  0xcc   : > { %s761_s22 = scalar_select %p795_p6, [#allocation5], [#allocation49] }
  0xcd   : > { %s1996_s11 = smov (!%p795_p6, %s316_s11), 0  ;;  %s1662_s0 = sand.u32 1, %s1331_s21 }
  0xce   : > { %s704_s19 = sshll.u32 %s300_s2, 4  ;;  %s1664_s6 = sld [smem:[%s761_s22 + %s1996_s11]] }
  0xcf   : > { %s302_s5 = scalar_lea.hbm %s1953_s1, %s704_s19  ;;  %s1360_s20 = smov [#allocation2 + $0x7]  }
  0xd0   : > { %s328_s12 = sshll.u32 %s1360_s20, 4  ;;  %s1041_s14 = scalar_lea.hbm %s302_s5, 16  ;;  %s329_s12 = int_to_ptr.vmem [resolvable:$true] %s328_s12 }
  0xd1   : > { %p1042_p11 = scmp.ne.s32.totalorder %s302_s5, %s1041_s14  ;;  %p1046_p0 = scmp.lt.s32.totalorder %s302_s5, %s1953_s1 }
  0xd2   : > { %p1047_p1 = scmp.lt.s32.totalorder %s1502_s7, %s1041_s14 }
  0xd3   : > { %p1043_p12 = pnand %p1042_p11, %p795_p6 }
  0xd4   : > { %p1048_p2 = por %p1047_p1, %p1046_p0 }
  0xd5   : > { %p1044_p13 = pneg %p1043_p12 }
  0xd7   : > { %p1049_p4 = pnand %p1048_p2, %p1044_p13 }
  0xd9   : > { %1052 = shalt.err (!%p1049_p4)  }
  0xda   : > { %s1053_s11 = scalar_lea.vmem %s1639_s10, 16  ;;  %p1060_p8 = scmp.lt.s32.totalorder %s1639_s10, %s1466_s18 }
  0xdb   : > { %p1054_p3 = scmp.ne.s32.totalorder %s1639_s10, %s1053_s11  ;;  %p1061_p9 = scmp.lt.s32.totalorder %s1513_s13, %s1053_s11 }
  0xdd   : > { %p1055_p5 = pnand %p1054_p3, %p795_p6  ;;  %p1062_p10 = por %p1061_p9, %p1060_p8 }
  0xdf   : > { %p1056_p7 = pneg %p1055_p5 }
  0xe1   : > { %p1063_p11 = pnand %p1062_p10, %p1056_p7 }
  0xe3   : > { %1066 = shalt.err (!%p1063_p11)  }
  0xe4   : > { %760 = dma.hbm_to_vmem [thread:$0]  (%p795_p6), %s302_s5, 16, %s1639_s10, [#allocation3] }
  0xe5   : > { %s332_s2 = sadd.s32 1, %s1331_s21  ;;  %s337_s15 = ssub.s32 1, %s1662_s0 }
  0xe6   : > { %p1686_p12 = scmp.lt.s32.totalorder %s332_s2, 3  ;;  %s1958_s22 = sshll.u32 %s1331_s21, 3 }
  0xe7   : > { %s705_s19 = sshll.u32 %s1664_s6, 4  ;;  %s733_s17 = sadd.s32 8, %s1958_s22 }
  0xe8   : > { %s319_s14 = scalar_lea.hbm %s1953_s1, %s705_s19  ;;  %s1699_s28 = sadd.s32 %s733_s17, %s1464_s16 }
  0xe9   : > { %s1067_s9 = scalar_lea.hbm %s319_s14, 16  ;;  %p1072_p2 = scmp.lt.s32.totalorder %s319_s14, %s1953_s1 }
  0xea   : > { %p1068_p13 = scmp.ne.s32.totalorder %s319_s14, %s1067_s9  ;;  %p1073_p4 = scmp.lt.s32.totalorder %s1502_s7, %s1067_s9 }
  0xec   : > { %p1069_p0 = pnand %p1068_p13, %p795_p6  ;;  %p1074_p3 = por %p1073_p4, %p1072_p2 }
  0xee   : > { %p1070_p1 = pneg %p1069_p0 }
  0xf0   : > { %p1075_p5 = pnand %p1074_p3, %p1070_p1 }
  0xf2   : > { %1078 = shalt.err (!%p1075_p5)  }
  0xf3   : > { %s1079_s6 = scalar_lea.vmem %s329_s12, 16  ;;  %p1086_p10 = scmp.lt.s32.totalorder %s329_s12, %s1466_s18 }
  0xf4   : > { %p1080_p7 = scmp.ne.s32.totalorder %s329_s12, %s1079_s6  ;;  %p1087_p11 = scmp.lt.s32.totalorder %s1513_s13, %s1079_s6 }
  0xf6   : > { %p1081_p8 = pnand %p1080_p7, %p795_p6  ;;  %p1088_p13 = por %p1087_p11, %p1086_p10 }
  0xf8   : > { %p1082_p9 = pneg %p1081_p8 }
  0xfa   : > { %p1089_p0 = pnand %p1088_p13, %p1082_p9 }
  0xfc   : > { %1092 = shalt.err (!%p1089_p0)  }
  0xfd   : > { %763 = dma.hbm_to_vmem [thread:$0]  (%p795_p6), %s319_s14, 16, %s329_s12, [#allocation3] }
  0xfe   : > { %s765_s16 = scalar_select %p1686_p12, [#allocation5], [#allocation50] }
  0xff   : > { %s766_s11 = scalar_select %p1686_p12, %s1699_s28, 0 }
 0x100   : > { %s709_s2 = sshll.u32 %s337_s15, 3  ;;  %s361_s9 = sadd.s32 1, %s1699_s28 }
 0x101   : > { %s342_s19 = sld [smem:[%s765_s16 + %s766_s11]]  ;;  %s1720_s17 = scalar_lea.vmem [#allocation2], %s709_s2 }
 0x102   : > { %s356_s29 = sshll.u32 %s1720_s17, 4  ;;  %s1998_s9 = smov (!%p1686_p12, %s361_s9), 0  ;;  %s357_s29 = int_to_ptr.vmem [resolvable:$true] %s356_s29 }
 0x103   : > { %s768_s12 = scalar_select %p1686_p12, [#allocation5], [#allocation51] }
 0x104   : > { %s611_s10 = scalar_lea.vmem %s1720_s17, 1 [#allocation2]  ;;  %s1737_s11 = scalar_lea.sflag [#allocation3], %s337_s15 }
 0x105   : > { %s1733_s16 = sld [smem:[%s768_s12 + %s1998_s9]] }
 0x107   : > { %s708_s14 = sshll.u32 %s342_s19, 4 }
 0x108   : > { %s344_s22 = scalar_lea.hbm %s1953_s1, %s708_s14 }
 0x109   : > { %s1093_s2 = scalar_lea.hbm %s344_s22, 16  ;;  %p1098_p4 = scmp.lt.s32.totalorder %s344_s22, %s1953_s1 }
 0x10a   : > { %p1094_p6 = scmp.ne.s32.totalorder %s344_s22, %s1093_s2  ;;  %p1099_p3 = scmp.lt.s32.totalorder %s1502_s7, %s1093_s2 }
 0x10c   : > { %p1095_p1 = pnand %p1094_p6, %p1686_p12  ;;  %p1100_p5 = por %p1099_p3, %p1098_p4 }
 0x10e   : > { %p1096_p2 = pneg %p1095_p1 }
 0x110   : > { %p1101_p7 = pnand %p1100_p5, %p1096_p2 }
 0x112   : > { %1104 = shalt.err (!%p1101_p7)  }
 0x113   : > { %s1105_s19 = scalar_lea.vmem %s357_s29, 16  ;;  %p1112_p11 = scmp.lt.s32.totalorder %s357_s29, %s1466_s18 }
 0x114   : > { %p1106_p8 = scmp.ne.s32.totalorder %s357_s29, %s1105_s19  ;;  %p1113_p13 = scmp.lt.s32.totalorder %s1513_s13, %s1105_s19 }
 0x116   : > { %p1107_p9 = pnand %p1106_p8, %p1686_p12  ;;  %p1114_p0 = por %p1113_p13, %p1112_p11 }
 0x118   : > { %p1108_p10 = pneg %p1107_p9 }
 0x11a   : > { %p1115_p6 = pnand %p1114_p0, %p1108_p10 }
 0x11c   : > { %1118 = shalt.err (!%p1115_p6)  }
 0x11d   : > { %767 = dma.hbm_to_vmem [thread:$0]  (%p1686_p12), %s344_s22, 16, %s357_s29, %s1737_s11 }
 0x11e   : > { %s374_s27 = sshll.u32 %s611_s10, 4  ;;  %s379_s15 = sadd.s32 2, %s1699_s28  ;;  %s375_s27 = int_to_ptr.vmem [resolvable:$true] %s374_s27 }
 0x11f   : > { %s616_s20 = scalar_lea.vmem %s1720_s17, 2 [#allocation2]  ;;  %s2000_s15 = smov (!%p1686_p12, %s379_s15), 0 }
 0x120   : > { %s771_s9 = scalar_select %p1686_p12, [#allocation5], [#allocation52] }
 0x121   : > { %s710_s12 = sshll.u32 %s1733_s16, 4  ;;  %s392_s14 = sshll.u32 %s616_s20, 4  ;;  %s1777_s14 = int_to_ptr.vmem [resolvable:$true] %s392_s14 }
 0x122   : > { %s364_s2 = scalar_lea.hbm %s1953_s1, %s710_s12  ;;  %s1762_s19 = sld [smem:[%s771_s9 + %s2000_s15]] }
 0x123   : > { %s1119_s26 = scalar_lea.hbm %s364_s2, 16  ;;  %p1124_p3 = scmp.lt.s32.totalorder %s364_s2, %s1953_s1 }
 0x124   : > { %p1120_p1 = scmp.ne.s32.totalorder %s364_s2, %s1119_s26  ;;  %p1125_p5 = scmp.lt.s32.totalorder %s1502_s7, %s1119_s26 }
 0x126   : > { %p1121_p2 = pnand %p1120_p1, %p1686_p12  ;;  %p1126_p7 = por %p1125_p5, %p1124_p3 }
 0x128   : > { %p1122_p4 = pneg %p1121_p2 }
 0x12a   : > { %p1127_p8 = pnand %p1126_p7, %p1122_p4 }
 0x12c   : > { %1130 = shalt.err (!%p1127_p8)  }
 0x12d   : > { %s1131_s10 = scalar_lea.vmem %s375_s27, 16  ;;  %p1138_p13 = scmp.lt.s32.totalorder %s375_s27, %s1466_s18 }
 0x12e   : > { %p1132_p9 = scmp.ne.s32.totalorder %s375_s27, %s1131_s10  ;;  %p1139_p0 = scmp.lt.s32.totalorder %s1513_s13, %s1131_s10 }
 0x130   : > { %p1133_p10 = pnand %p1132_p9, %p1686_p12  ;;  %p1140_p6 = por %p1139_p0, %p1138_p13 }
 0x132   : > { %p1134_p11 = pneg %p1133_p10 }
 0x134   : > { %p1141_p1 = pnand %p1140_p6, %p1134_p11 }
 0x136   : > { %1144 = shalt.err (!%p1141_p1)  }
 0x137   : > { %770 = dma.hbm_to_vmem [thread:$0]  (%p1686_p12), %s364_s2, 16, %s375_s27, %s1737_s11 }
 0x138   : > { %s397_s26 = sadd.s32 3, %s1699_s28  ;;  %s621_s15 = scalar_lea.vmem %s1720_s17, 3 [#allocation2] }
 0x139   : > { %s774_s16 = scalar_select %p1686_p12, [#allocation5], [#allocation53] }
 0x13a   : > { %s2002_s26 = smov (!%p1686_p12, %s397_s26), 0  ;;  %s415_s20 = sadd.s32 4, %s1699_s28 }
 0x13b   : > { %s712_s9 = sshll.u32 %s1762_s19, 4  ;;  %s1787_s12 = sld [smem:[%s774_s16 + %s2002_s26]] }
 0x13c   : > { %s382_s22 = scalar_lea.hbm %s1953_s1, %s712_s9  ;;  %s410_s29 = sshll.u32 %s621_s15, 4  ;;  %s411_s29 = int_to_ptr.vmem [resolvable:$true] %s410_s29 }
 0x13d   : > { %s1145_s10 = scalar_lea.hbm %s382_s22, 16  ;;  %p1150_p5 = scmp.lt.s32.totalorder %s382_s22, %s1953_s1 }
 0x13e   : > { %p1146_p2 = scmp.ne.s32.totalorder %s382_s22, %s1145_s10  ;;  %p1151_p7 = scmp.lt.s32.totalorder %s1502_s7, %s1145_s10 }
 0x140   : > { %p1147_p4 = pnand %p1146_p2, %p1686_p12  ;;  %p1152_p8 = por %p1151_p7, %p1150_p5 }
 0x142   : > { %p1148_p3 = pneg %p1147_p4 }
 0x144   : > { %p1153_p9 = pnand %p1152_p8, %p1148_p3 }
 0x146   : > { %1156 = shalt.err (!%p1153_p9)  }
 0x147   : > { %s1157_s19 = scalar_lea.vmem %s1777_s14, 16  ;;  %p1164_p0 = scmp.lt.s32.totalorder %s1777_s14, %s1466_s18 }
 0x148   : > { %p1158_p10 = scmp.ne.s32.totalorder %s1777_s14, %s1157_s19  ;;  %p1165_p6 = scmp.lt.s32.totalorder %s1513_s13, %s1157_s19 }
 0x14a   : > { %p1159_p11 = pnand %p1158_p10, %p1686_p12  ;;  %p1166_p1 = por %p1165_p6, %p1164_p0 }
 0x14c   : > { %p1160_p13 = pneg %p1159_p11 }
 0x14e   : > { %p1167_p2 = pnand %p1166_p1, %p1160_p13 }
 0x150   : > { %1170 = shalt.err (!%p1167_p2)  }
 0x151   : > { %773 = dma.hbm_to_vmem [thread:$0]  (%p1686_p12), %s382_s22, 16, %s1777_s14, %s1737_s11 }
 0x152   : > { %s626_s26 = scalar_lea.vmem %s1720_s17, 4 [#allocation2]  ;;  %s2004_s20 = smov (!%p1686_p12, %s415_s20), 0 }
 0x153   : > { %s777_s16 = scalar_select %p1686_p12, [#allocation5], [#allocation54] }
 0x154   : > { %s714_s15 = sshll.u32 %s1787_s12, 4  ;;  %s428_s9 = sshll.u32 %s626_s26, 4  ;;  %s1833_s9 = int_to_ptr.vmem [resolvable:$true] %s428_s9 }
 0x155   : > { %s400_s10 = scalar_lea.hbm %s1953_s1, %s714_s15  ;;  %s1818_s27 = sld [smem:[%s777_s16 + %s2004_s20]] }
 0x156   : > { %s1171_s2 = scalar_lea.hbm %s400_s10, 16  ;;  %p1176_p7 = scmp.lt.s32.totalorder %s400_s10, %s1953_s1 }
 0x157   : > { %p1172_p4 = scmp.ne.s32.totalorder %s400_s10, %s1171_s2  ;;  %p1177_p8 = scmp.lt.s32.totalorder %s1502_s7, %s1171_s2 }
 0x159   : > { %p1173_p3 = pnand %p1172_p4, %p1686_p12  ;;  %p1178_p9 = por %p1177_p8, %p1176_p7 }
 0x15b   : > { %p1174_p5 = pneg %p1173_p3 }
 0x15d   : > { %p1179_p10 = pnand %p1178_p9, %p1174_p5 }
 0x15f   : > { %1182 = shalt.err (!%p1179_p10)  }
 0x160   : > { %s1183_s12 = scalar_lea.vmem %s411_s29, 16  ;;  %p1190_p6 = scmp.lt.s32.totalorder %s411_s29, %s1466_s18 }
 0x161   : > { %p1184_p11 = scmp.ne.s32.totalorder %s411_s29, %s1183_s12  ;;  %p1191_p1 = scmp.lt.s32.totalorder %s1513_s13, %s1183_s12 }
 0x163   : > { %p1185_p13 = pnand %p1184_p11, %p1686_p12  ;;  %p1192_p2 = por %p1191_p1, %p1190_p6 }
 0x165   : > { %p1186_p0 = pneg %p1185_p13 }
 0x167   : > { %p1193_p4 = pnand %p1192_p2, %p1186_p0 }
 0x169   : > { %1196 = shalt.err (!%p1193_p4)  }
 0x16a   : > { %776 = dma.hbm_to_vmem [thread:$0]  (%p1686_p12), %s400_s10, 16, %s411_s29, %s1737_s11 }
 0x16b   : > { %s433_s20 = sadd.s32 5, %s1699_s28  ;;  %s631_s26 = scalar_lea.vmem %s1720_s17, 5 [#allocation2] }
 0x16c   : > { %s780_s19 = scalar_select %p1686_p12, [#allocation5], [#allocation55] }
 0x16d   : > { %s2006_s20 = smov (!%p1686_p12, %s433_s20), 0  ;;  %s451_s16 = sadd.s32 6, %s1699_s28 }
 0x16e   : > { %s716_s15 = sshll.u32 %s1818_s27, 4  ;;  %s434_s5 = sld [smem:[%s780_s19 + %s2006_s20]] }
 0x16f   : > { %s418_s14 = scalar_lea.hbm %s1953_s1, %s716_s15  ;;  %s446_s22 = sshll.u32 %s631_s26, 4  ;;  %s447_s22 = int_to_ptr.vmem [resolvable:$true] %s446_s22 }
 0x170   : > { %s1197_s12 = scalar_lea.hbm %s418_s14, 16  ;;  %p1202_p8 = scmp.lt.s32.totalorder %s418_s14, %s1953_s1 }
 0x171   : > { %p1198_p3 = scmp.ne.s32.totalorder %s418_s14, %s1197_s12  ;;  %p1203_p9 = scmp.lt.s32.totalorder %s1502_s7, %s1197_s12 }
 0x173   : > { %p1199_p5 = pnand %p1198_p3, %p1686_p12  ;;  %p1204_p10 = por %p1203_p9, %p1202_p8 }
 0x175   : > { %p1200_p7 = pneg %p1199_p5 }
 0x177   : > { %p1205_p11 = pnand %p1204_p10, %p1200_p7 }
 0x179   : > { %1208 = shalt.err (!%p1205_p11)  }
 0x17a   : > { %s1209_s27 = scalar_lea.vmem %s1833_s9, 16  ;;  %p1216_p1 = scmp.lt.s32.totalorder %s1833_s9, %s1466_s18 }
 0x17b   : > { %p1210_p13 = scmp.ne.s32.totalorder %s1833_s9, %s1209_s27  ;;  %p1217_p2 = scmp.lt.s32.totalorder %s1513_s13, %s1209_s27 }
 0x17d   : > { %p1211_p0 = pnand %p1210_p13, %p1686_p12  ;;  %p1218_p4 = por %p1217_p2, %p1216_p1 }
 0x17f   : > { %p1212_p6 = pneg %p1211_p0 }
 0x181   : > { %p1219_p3 = pnand %p1218_p4, %p1212_p6 }
 0x183   : > { %1222 = shalt.err (!%p1219_p3)  }
 0x184   : > { %779 = dma.hbm_to_vmem [thread:$0]  (%p1686_p12), %s418_s14, 16, %s1833_s9, %s1737_s11 }
 0x185   : > { %s783_s20 = scalar_select %p1686_p12, [#allocation5], [#allocation56] }
 0x186   : > { %s2008_s16 = smov (!%p1686_p12, %s451_s16), 0  ;;  %s718_s19 = sshll.u32 %s434_s5, 4 }
 0x187   : > { %s636_s26 = scalar_lea.vmem %s1720_s17, 6 [#allocation2]  ;;  %s436_s2 = scalar_lea.hbm %s1953_s1, %s718_s19 }
 0x188   : > { %s1871_s12 = sld [smem:[%s783_s20 + %s2008_s16]]  ;;  %s1223_s29 = scalar_lea.hbm %s436_s2, 16 }
 0x189   : > { %p1224_p5 = scmp.ne.s32.totalorder %s436_s2, %s1223_s29  ;;  %p1228_p9 = scmp.lt.s32.totalorder %s436_s2, %s1953_s1 }
 0x18a   : > { %p1229_p10 = scmp.lt.s32.totalorder %s1502_s7, %s1223_s29 }
 0x18b   : > { %p1225_p7 = pnand %p1224_p5, %p1686_p12 }
 0x18c   : > { %p1230_p11 = por %p1229_p10, %p1228_p9 }
 0x18d   : > { %p1226_p8 = pneg %p1225_p7 }
 0x18f   : > { %p1231_p13 = pnand %p1230_p11, %p1226_p8 }
 0x191   : > { %1234 = shalt.err (!%p1231_p13)  }
 0x192   : > { %s1235_s5 = scalar_lea.vmem %s447_s22, 16  ;;  %p1242_p2 = scmp.lt.s32.totalorder %s447_s22, %s1466_s18 }
 0x193   : > { %p1236_p0 = scmp.ne.s32.totalorder %s447_s22, %s1235_s5  ;;  %p1243_p4 = scmp.lt.s32.totalorder %s1513_s13, %s1235_s5 }
 0x195   : > { %p1237_p6 = pnand %p1236_p0, %p1686_p12  ;;  %p1244_p3 = por %p1243_p4, %p1242_p2 }
 0x197   : > { %p1238_p1 = pneg %p1237_p6 }
 0x199   : > { %p1245_p5 = pnand %p1244_p3, %p1238_p1 }
 0x19b   : > { %1248 = shalt.err (!%p1245_p5)  }
 0x19c   : > { %782 = dma.hbm_to_vmem [thread:$0]  (%p1686_p12), %s436_s2, 16, %s447_s22, %s1737_s11 }
 0x19d   : > { %s464_s16 = sshll.u32 %s636_s26, 4  ;;  %s469_s14 = sadd.s32 7, %s1699_s28  ;;  %s465_s16 = int_to_ptr.vmem [resolvable:$true] %s464_s16 }
 0x19e   : > { %s786_s27 = scalar_select %p1686_p12, [#allocation5], [#allocation57] }
 0x19f   : > { %s2010_s14 = smov (!%p1686_p12, %s469_s14), 0  ;;  %s641_s20 = scalar_lea.vmem %s1720_s17, 7 [#allocation2] }
 0x1a0   : > { %s720_s19 = sshll.u32 %s1871_s12, 4  ;;  %s470_s15 = sld [smem:[%s786_s27 + %s2010_s14]] }
 0x1a1   : > { %s454_s10 = scalar_lea.hbm %s1953_s1, %s720_s19  ;;  %s482_s9 = sshll.u32 %s641_s20, 4  ;;  %s483_s9 = int_to_ptr.vmem [resolvable:$true] %s482_s9 }
 0x1a2   : > { %s1249_s5 = scalar_lea.hbm %s454_s10, 16  ;;  %p1254_p10 = scmp.lt.s32.totalorder %s454_s10, %s1953_s1 }
 0x1a3   : > { %p1250_p7 = scmp.ne.s32.totalorder %s454_s10, %s1249_s5  ;;  %p1255_p11 = scmp.lt.s32.totalorder %s1502_s7, %s1249_s5 }
 0x1a5   : > { %p1251_p8 = pnand %p1250_p7, %p1686_p12  ;;  %p1256_p13 = por %p1255_p11, %p1254_p10 }
 0x1a7   : > { %p1252_p9 = pneg %p1251_p8 }
 0x1a9   : > { %p1257_p0 = pnand %p1256_p13, %p1252_p9 }
 0x1ab   : > { %1260 = shalt.err (!%p1257_p0)  }
 0x1ac   : > { %s1261_s17 = scalar_lea.vmem %s465_s16, 16  ;;  %p1268_p4 = scmp.lt.s32.totalorder %s465_s16, %s1466_s18 }
 0x1ad   : > { %p1262_p6 = scmp.ne.s32.totalorder %s465_s16, %s1261_s17  ;;  %p1269_p3 = scmp.lt.s32.totalorder %s1513_s13, %s1261_s17 }
 0x1af   : > { %p1263_p1 = pnand %p1262_p6, %p1686_p12  ;;  %p1270_p5 = por %p1269_p3, %p1268_p4 }
 0x1b1   : > { %p1264_p2 = pneg %p1263_p1 }
 0x1b3   : > { %p1271_p7 = pnand %p1270_p5, %p1264_p2 }
 0x1b5   : > { %1274 = shalt.err (!%p1271_p7)  }
 0x1b6   : > { %785 = dma.hbm_to_vmem [thread:$0]  (%p1686_p12), %s454_s10, 16, %s465_s16, %s1737_s11 }
 0x1b7   : > { %s722_s26 = sshll.u32 %s470_s15, 4 }
 0x1b8   : > { %s472_s14 = scalar_lea.hbm %s1953_s1, %s722_s26 }
 0x1b9   : > { %s1275_s27 = scalar_lea.hbm %s472_s14, 16  ;;  %p1280_p11 = scmp.lt.s32.totalorder %s472_s14, %s1953_s1 }
 0x1ba   : > { %p1276_p8 = scmp.ne.s32.totalorder %s472_s14, %s1275_s27  ;;  %p1281_p13 = scmp.lt.s32.totalorder %s1502_s7, %s1275_s27 }
 0x1bc   : > { %p1277_p9 = pnand %p1276_p8, %p1686_p12  ;;  %p1282_p0 = por %p1281_p13, %p1280_p11 }
 0x1be   : > { %p1278_p10 = pneg %p1277_p9 }
 0x1c0   : > { %p1283_p6 = pnand %p1282_p0, %p1278_p10 }
 0x1c2   : > { %1286 = shalt.err (!%p1283_p6)  }
 0x1c3   : > { %s1287_s16 = scalar_lea.vmem %s483_s9, 16  ;;  %p1294_p3 = scmp.lt.s32.totalorder %s483_s9, %s1466_s18 }
 0x1c4   : > { %p1288_p1 = scmp.ne.s32.totalorder %s483_s9, %s1287_s16  ;;  %p1295_p5 = scmp.lt.s32.totalorder %s1513_s13, %s1287_s16 }
 0x1c6   : > { %p1289_p2 = pnand %p1288_p1, %p1686_p12  ;;  %p1296_p7 = por %p1295_p5, %p1294_p3 }
 0x1c8   : > { %p1290_p4 = pneg %p1289_p2 }
 0x1ca   : > { %p1297_p8 = pnand %p1296_p7, %p1290_p4 }
 0x1cc   : > { %1300 = shalt.err (!%p1297_p8)  }
 0x1cd   : > { %788 = dma.hbm_to_vmem [thread:$0]  (%p1686_p12), %s472_s14, 16, %s483_s9, %s1737_s11 }
 0x1ce   : > { %s1969_s7 = sshll.u32 %s1662_s0, 3  ;;  %s488_s6 = scalar_lea.sflag [#allocation3], %s1662_s0 }
 0x1cf   : > { %s487_s15 = scalar_lea.vmem [#allocation2], %s1969_s7 }
 0x1d0   : > { %1327 = dma.done.wait %s488_s6, 128 }
 0x1d1   : > { %1328 = vsyncadd %s488_s6, 4294967168  ;;  %s1970_s29 = sshll.u32 %s1331_s21, 3  ;;  %v495_v1 = vld [vmem:[%s487_s15] sm:$0xff] }
 0x1d2   : > { %s493_s10 = scalar_lea.vmem [#allocation6], %s1970_s29  ;;  %v726_v14 = vld [vmem:[%s1955_s3] ss:$0 sm:$0xff] }
 0x1d3   : > { %v494_v0 = vld [vmem:[%s493_s10] sm:$0xff] }
 0x1d4   : > { %v496_v2 = vadd.f32 %v495_v1, %v494_v0  ;;  %v727_v16 = vld [vmem:[%s1956_s4] ss:$0 sm:$0xff] }
 0x1d6   : > { %497 = vadd.xlane.f32.xlu0 %v496_v2  ;;  %v499_v3 = vmul.f32 %v496_v2, %v496_v2 }
 0x1da   : > { %500 = vadd.xlane.f32.xlu0 %v499_v3 }
 0x25f   : > { %v498_v4 = vpop.xlane.xlu0 %497 }
 0x260   : > { %v502_v5 = vmul.f32 0.0078125, %v498_v4 }
 0x262   : > { %v504_v7 = vmul.f32 %v502_v5, %v502_v5  ;;  %v511_v12 = vsub.f32 %v496_v2, %v502_v5 }
 0x263   : > { %v501_v6 = vpop.xlane.xlu0 %500 }
 0x264   : > { %v503_v8 = vmul.f32 0.0078125, %v501_v6 }
 0x266   : > { %v505_v9 = vsub.f32 %v503_v8, %v504_v7 }
 0x268   : > { %v506_v10 = vmax.f32 %v505_v9, 0.0 }
 0x26a   : > { %v507_v11 = vadd.f32 1e-12, %v506_v10 }
 0x26c   : > { %849 = vrsqrt.f32 %v507_v11 }
 0x279   : > { %v850_v13 = vpop.eup %849 }
 0x27a   : > { %v512_v15 = vmul.f32 %v850_v13, %v511_v12 }
 0x27c   : > { %v519_v17 = vmul.f32 %v726_v14, %v512_v15 }
 0x27e   : > { %v526_v18 = vadd.f32 %v727_v16, %v519_v17 }
 0x280   : > { %527 = vst [vmem:[%s1472_s30] sm:$0xff] %v526_v18 }
 0x281 PF: > { %s20_s25 = sadd.s32 1, %s1347_s25   ;;  %s1971_s8 = sld [smem:[#allocation61_spill]] }
 0x282   : > { %p17_p12 = scmp.ge.s32.totalorder %s20_s25, 8   ;;  %s1972_s11 = sld [smem:[#allocation62_spill]] }
 0x283   : > { %s1973_s21 = smov %s1339_s23  ;;  %s1974_s22 = smov %s1343_s24 }
 0x284   :  { %19 = sbr.rel (!%p17_p12) target bundleno = 10 (0xa), region = 172 }
 0x287   : > { %s1975_s23 = smov %s1971_s8 }
 0x288   : > { %s1976_s24 = smov %s1972_s11 }
 0x289   :  { %555 = vsyncpa [#allocation7], 1 }
 0x28a   :  { %557 = vsyncpa [#allocation7 + $0x1], 1 }
 0x28b   :  { %558 = vsyncmov [#allocation3] }
 0x28e   :  { %s559_s30 = vpop.sfrf %558 }
 0x28f   :  { %p730_p9 = scmp.ne.s32.totalorder %s559_s30, 0 }
 0x291   :  { %563 = shalt.err (%p730_p9)  }
 0x292   :  { %565 = vsyncmov [#allocation3 + $0x1] }
 0x295   :  { %s566_s9 = vpop.sfrf %565 }
 0x296   :  { %p731_p10 = scmp.ne.s32.totalorder %s566_s9, 0 }
 0x298   :  { %570 = shalt.err (%p731_p10)  }

</bundles_post_ra>
